<compile_context>
chip_gen: v5e
topology: v5e:2x2
jax: 0.10.0
libtpu: 0.0.40
codegen_flags: <defaults>
</compile_context>

<pallas_src>
import functools

import jax
import jax.numpy as jnp
from jax import lax
from jax.experimental import pallas as pl
from jax.experimental.pallas import tpu as pltpu

EPS = 1e-5


def _residual_block_kernel(x_ref, masks_ref, w1_ref, g1_ref, b1_ref,
                           w2_ref, g2_ref, b2_ref, o_ref, *, W):
    """Fused residual block on channel-major, spatial-flat (C, P) tiles.

    x_ref:      (Cin,  P)   input, P = N*H*W on the lane axis
    masks_ref:  (9, 1, P)   per-tap zero-padding validity masks (kh-major)
    w*_ref:     (Cout, 9*Cin) conv weights, column order (kh, kw, cin)
    g*_/b*_ref: (Cout, 1)   BatchNorm affine params
    o_ref:      (Cout, P)   lane-dense output
    """
    P = x_ref.shape[1]
    masks = masks_ref[...]                      # (9, 1, P)

    def shift_lanes(xv, d):
        # out[:, p] = xv[:, (p + d) mod P]; wrapped lanes are masked to zero.
        s = d % P
        if s == 0:
            return xv
        return jnp.concatenate([xv[:, s:], xv[:, :s]], axis=-1)

    def conv3x3(xv, wmat):
        # 3x3 SAME conv = sum over 9 taps of a shifted 1x1 conv:
        #   (Cout, Cin) @ (Cin, P) -> lane-dense (Cout, P), f32 accumulate.
        cin = xv.shape[0]
        acc = None
        for t in range(9):
            kh, kw = t // 3, t % 3
            d = (kh - 1) * W + (kw - 1)         # flat spatial offset of the tap
            xs = shift_lanes(xv, d) * masks[t]  # (Cin, P), padding zeroed
            y = jnp.dot(wmat[:, t * cin:(t + 1) * cin], xs,
                        preferred_element_type=jnp.float32)
            acc = y if acc is None else acc + y
        return acc

    def bn_relu(y, gamma, beta, residual=None):
        # Training-mode BatchNorm: batch stats over all P = N*H*W positions,
        # biased variance, single sum/sumsq pass, normalize+affine folded into
        # one FMA (y * scale + shift).  rsqrt goes to the EUP (free slot).
        inv_p = 1.0 / P
        mean = jnp.sum(y, axis=1, keepdims=True) * inv_p        # (C, 1)
        ex2 = jnp.sum(y * y, axis=1, keepdims=True) * inv_p     # (C, 1)
        var = ex2 - mean * mean
        scale = gamma * lax.rsqrt(var + EPS)                    # (C, 1)
        shift = beta - mean * scale
        out = y * scale + shift
        if residual is not None:
            out = out + residual
        return jnp.maximum(out, 0.0)

    xv = x_ref[...]                                             # (Cin, P)
    h1 = bn_relu(conv3x3(xv, w1_ref[...]), g1_ref[...], b1_ref[...])
    out = bn_relu(conv3x3(h1, w2_ref[...]), g2_ref[...], b2_ref[...],
                  residual=xv)                                  # identity shortcut
    o_ref[...] = out.astype(o_ref.dtype)


def _tap_masks(n, h, w):
    """(9, 1, N*H*W) f32: 1 where tap (kh, kw) reads an in-bounds pixel."""
    idx = jnp.arange(n * h * w, dtype=jnp.int32)
    hh = (idx // w) % h
    ww = idx % w
    masks = []
    for kh in range(3):
        for kw in range(3):
            dh, dw = kh - 1, kw - 1
            masks.append((hh + dh >= 0) & (hh + dh < h) &
                         (ww + dw >= 0) & (ww + dw < w))
    return jnp.stack(masks).astype(jnp.float32).reshape(9, 1, n * h * w)


def _w_oihw_to_2d(w_oihw):
    """PyTorch (Cout, Cin, 3, 3) -> (Cout, 9*Cin), column order (kh, kw, cin)."""
    cout, cin = w_oihw.shape[0], w_oihw.shape[1]
    return jnp.transpose(w_oihw, (0, 2, 3, 1)).reshape(cout, 9 * cin)


def residual_block(x_nchw, w1, g1, b1, w2, g2, b2):
    """Forward pass of ResidualBlock(n_in, n_out, stride=1, downsample=False)."""
    n, cin, h, w = x_nchw.shape
    cout1, cout2 = w1.shape[0], w2.shape[0]
    assert cin == cout2, "identity shortcut requires n_in == n_out"
    p = n * h * w

    # Channel-major, spatial-flat layout: channels on sublanes, P on lanes.
    # (Single cheap layout op each way; the interior is fully fused.)
    xf = jnp.transpose(x_nchw, (1, 0, 2, 3)).reshape(cin, p).astype(jnp.float32)

    out = pl.pallas_call(
        functools.partial(_residual_block_kernel, W=w),
        out_shape=jax.ShapeDtypeStruct((cout2, p), jnp.float32),
        in_specs=[pl.BlockSpec(memory_space=pltpu.MemorySpace.VMEM)] * 8,
        out_specs=pl.BlockSpec(memory_space=pltpu.MemorySpace.VMEM),
    )(xf,
      _tap_masks(n, h, w),
      _w_oihw_to_2d(w1).astype(jnp.float32),
      g1.reshape(cout1, 1).astype(jnp.float32),
      b1.reshape(cout1, 1).astype(jnp.float32),
      _w_oihw_to_2d(w2).astype(jnp.float32),
      g2.reshape(cout2, 1).astype(jnp.float32),
      b2.reshape(cout2, 1).astype(jnp.float32))

    # Back to NCHW to match the PyTorch module interface.
    return jnp.transpose(out.reshape(cout2, n, h, w), (1, 0, 2, 3))


def _reference(x_nchw, w1, g1, b1, w2, g2, b2):
    """Pure-JAX reference mirroring the PyTorch forward (training-mode BN)."""
    def conv(x, w):
        return lax.conv_general_dilated(
            x, w, window_strides=(1, 1), padding="SAME",
            dimension_numbers=("NCHW", "OIHW", "NCHW"))

    def bn(y, g, b):
        mean = jnp.mean(y, axis=(0, 2, 3), keepdims=True)
        var = jnp.mean((y - mean) ** 2, axis=(0, 2, 3), keepdims=True)
        return (y - mean) * lax.rsqrt(var + EPS) * g.reshape(1, -1, 1, 1) \
            + b.reshape(1, -1, 1, 1)

    h = jax.nn.relu(bn(conv(x_nchw, w1), g1, b1))
    return jax.nn.relu(bn(conv(h, w2), g2, b2) + x_nchw)


if __name__ == "__main__":
    N, C_IN, H, W = 2, 4, 16, 16
    N_OUT = 4  # ResidualBlock(n_in=4, n_out=4, stride=1, downsample=False)

    key = jax.random.PRNGKey(0)
    kx, k1, k2, kg1, kb1, kg2, kb2 = jax.random.split(key, 7)

    x = jax.random.normal(kx, (N, C_IN, H, W), jnp.float32)
    # conv weights in PyTorch OIHW layout, no bias
    w1 = jax.random.normal(k1, (N_OUT, C_IN, 3, 3), jnp.float32) * 0.2
    w2 = jax.random.normal(k2, (N_OUT, N_OUT, 3, 3), jnp.float32) * 0.2
    # BN affine params (randomized but deterministic)
    g1 = 1.0 + 0.1 * jax.random.normal(kg1, (N_OUT,), jnp.float32)
    b1 = 0.1 * jax.random.normal(kb1, (N_OUT,), jnp.float32)
    g2 = 1.0 + 0.1 * jax.random.normal(kg2, (N_OUT,), jnp.float32)
    b2 = 0.1 * jax.random.normal(kb2, (N_OUT,), jnp.float32)

    out = jax.block_until_ready(residual_block(x, w1, g1, b1, w2, g2, b2))
    ref = jax.block_until_ready(_reference(x, w1, g1, b1, w2, g2, b2))

    assert out.shape == (N, N_OUT, H, W), out.shape
    assert jnp.allclose(out, ref, atol=5e-4, rtol=5e-4), \
        float(jnp.max(jnp.abs(out - ref)))

    print("KERNEL_OK")
</pallas_src>

<mosaic_0001>
module attributes {stable_mosaic.version = 11 : i64} {
  func.func @_residual_block_kernel(%arg0: memref<4x512xf32, #tpu.memory_space<vmem>>, %arg1: memref<9x1x512xf32, #tpu.memory_space<vmem>>, %arg2: memref<4x36xf32, #tpu.memory_space<vmem>>, %arg3: memref<4x1xf32, #tpu.memory_space<vmem>>, %arg4: memref<4x1xf32, #tpu.memory_space<vmem>>, %arg5: memref<4x36xf32, #tpu.memory_space<vmem>>, %arg6: memref<4x1xf32, #tpu.memory_space<vmem>>, %arg7: memref<4x1xf32, #tpu.memory_space<vmem>>, %arg8: memref<4x512xf32, #tpu.memory_space<vmem>>) attributes {dimension_semantics = [], scalar_prefetch = 0 : i64, scratch_operands = 0 : i64, tpu.core_type = #tpu.core_type<tc>} {
    %c0 = arith.constant 0 : index
    %c0_0 = arith.constant 0 : index
    %c0_1 = arith.constant 0 : index
    %0 = vector.load %arg1[%c0, %c0_0, %c0_1] : memref<9x1x512xf32, #tpu.memory_space<vmem>>, vector<9x1x512xf32>
    %c0_2 = arith.constant 0 : index
    %c0_3 = arith.constant 0 : index
    %1 = vector.load %arg0[%c0_2, %c0_3] : memref<4x512xf32, #tpu.memory_space<vmem>>, vector<4x512xf32>
    %c0_4 = arith.constant 0 : index
    %c0_5 = arith.constant 0 : index
    %2 = vector.load %arg2[%c0_4, %c0_5] : memref<4x36xf32, #tpu.memory_space<vmem>>, vector<4x36xf32>
    %3 = vector.extract_strided_slice %1 {offsets = [0, 495], sizes = [4, 17], strides = [1, 1]} : vector<4x512xf32> to vector<4x17xf32>
    %4 = vector.extract_strided_slice %1 {offsets = [0, 0], sizes = [4, 495], strides = [1, 1]} : vector<4x512xf32> to vector<4x495xf32>
    %5 = tpu.concatenate %3, %4 in 1 : vector<4x17xf32>, vector<4x495xf32> -> vector<4x512xf32>
    %6 = vector.extract_strided_slice %0 {offsets = [0, 0, 0], sizes = [1, 1, 512], strides = [1, 1, 1]} : vector<9x1x512xf32> to vector<1x1x512xf32>
    %7 = vector.shape_cast %6 : vector<1x1x512xf32> to vector<1x512xf32>
    %8 = vector.broadcast %7 : vector<1x512xf32> to vector<4x512xf32>
    %9 = arith.mulf %5, %8 : vector<4x512xf32>
    %10 = vector.extract_strided_slice %2 {offsets = [0, 0], sizes = [4, 4], strides = [1, 1]} : vector<4x36xf32> to vector<4x4xf32>
    %cst = arith.constant dense<0.000000e+00> : vector<4x512xf32>
    %11 = tpu.matmul %10, %9, %cst {dimension_numbers = #tpu.dot_dimension_numbers<[1], [0], [0], [1], [0, 0, 1, 1], [], []>} : vector<4x4xf32>, vector<4x512xf32>, vector<4x512xf32> -> vector<4x512xf32>
    %12 = vector.extract_strided_slice %1 {offsets = [0, 496], sizes = [4, 16], strides = [1, 1]} : vector<4x512xf32> to vector<4x16xf32>
    %13 = vector.extract_strided_slice %1 {offsets = [0, 0], sizes = [4, 496], strides = [1, 1]} : vector<4x512xf32> to vector<4x496xf32>
    %14 = tpu.concatenate %12, %13 in 1 : vector<4x16xf32>, vector<4x496xf32> -> vector<4x512xf32>
    %15 = vector.extract_strided_slice %0 {offsets = [1, 0, 0], sizes = [1, 1, 512], strides = [1, 1, 1]} : vector<9x1x512xf32> to vector<1x1x512xf32>
    %16 = vector.shape_cast %15 : vector<1x1x512xf32> to vector<1x512xf32>
    %17 = vector.broadcast %16 : vector<1x512xf32> to vector<4x512xf32>
    %18 = arith.mulf %14, %17 : vector<4x512xf32>
    %19 = vector.extract_strided_slice %2 {offsets = [0, 4], sizes = [4, 4], strides = [1, 1]} : vector<4x36xf32> to vector<4x4xf32>
    %cst_6 = arith.constant dense<0.000000e+00> : vector<4x512xf32>
    %20 = tpu.matmul %19, %18, %cst_6 {dimension_numbers = #tpu.dot_dimension_numbers<[1], [0], [0], [1], [0, 0, 1, 1], [], []>} : vector<4x4xf32>, vector<4x512xf32>, vector<4x512xf32> -> vector<4x512xf32>
    %21 = arith.addf %11, %20 : vector<4x512xf32>
    %22 = vector.extract_strided_slice %1 {offsets = [0, 497], sizes = [4, 15], strides = [1, 1]} : vector<4x512xf32> to vector<4x15xf32>
    %23 = vector.extract_strided_slice %1 {offsets = [0, 0], sizes = [4, 497], strides = [1, 1]} : vector<4x512xf32> to vector<4x497xf32>
    %24 = tpu.concatenate %22, %23 in 1 : vector<4x15xf32>, vector<4x497xf32> -> vector<4x512xf32>
    %25 = vector.extract_strided_slice %0 {offsets = [2, 0, 0], sizes = [1, 1, 512], strides = [1, 1, 1]} : vector<9x1x512xf32> to vector<1x1x512xf32>
    %26 = vector.shape_cast %25 : vector<1x1x512xf32> to vector<1x512xf32>
    %27 = vector.broadcast %26 : vector<1x512xf32> to vector<4x512xf32>
    %28 = arith.mulf %24, %27 : vector<4x512xf32>
    %29 = vector.extract_strided_slice %2 {offsets = [0, 8], sizes = [4, 4], strides = [1, 1]} : vector<4x36xf32> to vector<4x4xf32>
    %cst_7 = arith.constant dense<0.000000e+00> : vector<4x512xf32>
    %30 = tpu.matmul %29, %28, %cst_7 {dimension_numbers = #tpu.dot_dimension_numbers<[1], [0], [0], [1], [0, 0, 1, 1], [], []>} : vector<4x4xf32>, vector<4x512xf32>, vector<4x512xf32> -> vector<4x512xf32>
    %31 = arith.addf %21, %30 : vector<4x512xf32>
    %32 = vector.extract_strided_slice %1 {offsets = [0, 511], sizes = [4, 1], strides = [1, 1]} : vector<4x512xf32> to vector<4x1xf32>
    %33 = vector.extract_strided_slice %1 {offsets = [0, 0], sizes = [4, 511], strides = [1, 1]} : vector<4x512xf32> to vector<4x511xf32>
    %34 = tpu.concatenate %32, %33 in 1 : vector<4x1xf32>, vector<4x511xf32> -> vector<4x512xf32>
    %35 = vector.extract_strided_slice %0 {offsets = [3, 0, 0], sizes = [1, 1, 512], strides = [1, 1, 1]} : vector<9x1x512xf32> to vector<1x1x512xf32>
    %36 = vector.shape_cast %35 : vector<1x1x512xf32> to vector<1x512xf32>
    %37 = vector.broadcast %36 : vector<1x512xf32> to vector<4x512xf32>
    %38 = arith.mulf %34, %37 : vector<4x512xf32>
    %39 = vector.extract_strided_slice %2 {offsets = [0, 12], sizes = [4, 4], strides = [1, 1]} : vector<4x36xf32> to vector<4x4xf32>
    %cst_8 = arith.constant dense<0.000000e+00> : vector<4x512xf32>
    %40 = tpu.matmul %39, %38, %cst_8 {dimension_numbers = #tpu.dot_dimension_numbers<[1], [0], [0], [1], [0, 0, 1, 1], [], []>} : vector<4x4xf32>, vector<4x512xf32>, vector<4x512xf32> -> vector<4x512xf32>
    %41 = arith.addf %31, %40 : vector<4x512xf32>
    %42 = vector.extract_strided_slice %0 {offsets = [4, 0, 0], sizes = [1, 1, 512], strides = [1, 1, 1]} : vector<9x1x512xf32> to vector<1x1x512xf32>
    %43 = vector.shape_cast %42 : vector<1x1x512xf32> to vector<1x512xf32>
    %44 = vector.broadcast %43 : vector<1x512xf32> to vector<4x512xf32>
    %45 = arith.mulf %1, %44 : vector<4x512xf32>
    %46 = vector.extract_strided_slice %2 {offsets = [0, 16], sizes = [4, 4], strides = [1, 1]} : vector<4x36xf32> to vector<4x4xf32>
    %cst_9 = arith.constant dense<0.000000e+00> : vector<4x512xf32>
    %47 = tpu.matmul %46, %45, %cst_9 {dimension_numbers = #tpu.dot_dimension_numbers<[1], [0], [0], [1], [0, 0, 1, 1], [], []>} : vector<4x4xf32>, vector<4x512xf32>, vector<4x512xf32> -> vector<4x512xf32>
    %48 = arith.addf %41, %47 : vector<4x512xf32>
    %49 = vector.extract_strided_slice %1 {offsets = [0, 1], sizes = [4, 511], strides = [1, 1]} : vector<4x512xf32> to vector<4x511xf32>
    %50 = vector.extract_strided_slice %1 {offsets = [0, 0], sizes = [4, 1], strides = [1, 1]} : vector<4x512xf32> to vector<4x1xf32>
    %51 = tpu.concatenate %49, %50 in 1 : vector<4x511xf32>, vector<4x1xf32> -> vector<4x512xf32>
    %52 = vector.extract_strided_slice %0 {offsets = [5, 0, 0], sizes = [1, 1, 512], strides = [1, 1, 1]} : vector<9x1x512xf32> to vector<1x1x512xf32>
    %53 = vector.shape_cast %52 : vector<1x1x512xf32> to vector<1x512xf32>
    %54 = vector.broadcast %53 : vector<1x512xf32> to vector<4x512xf32>
    %55 = arith.mulf %51, %54 : vector<4x512xf32>
    %56 = vector.extract_strided_slice %2 {offsets = [0, 20], sizes = [4, 4], strides = [1, 1]} : vector<4x36xf32> to vector<4x4xf32>
    %cst_10 = arith.constant dense<0.000000e+00> : vector<4x512xf32>
    %57 = tpu.matmul %56, %55, %cst_10 {dimension_numbers = #tpu.dot_dimension_numbers<[1], [0], [0], [1], [0, 0, 1, 1], [], []>} : vector<4x4xf32>, vector<4x512xf32>, vector<4x512xf32> -> vector<4x512xf32>
    %58 = arith.addf %48, %57 : vector<4x512xf32>
    %59 = vector.extract_strided_slice %1 {offsets = [0, 15], sizes = [4, 497], strides = [1, 1]} : vector<4x512xf32> to vector<4x497xf32>
    %60 = vector.extract_strided_slice %1 {offsets = [0, 0], sizes = [4, 15], strides = [1, 1]} : vector<4x512xf32> to vector<4x15xf32>
    %61 = tpu.concatenate %59, %60 in 1 : vector<4x497xf32>, vector<4x15xf32> -> vector<4x512xf32>
    %62 = vector.extract_strided_slice %0 {offsets = [6, 0, 0], sizes = [1, 1, 512], strides = [1, 1, 1]} : vector<9x1x512xf32> to vector<1x1x512xf32>
    %63 = vector.shape_cast %62 : vector<1x1x512xf32> to vector<1x512xf32>
    %64 = vector.broadcast %63 : vector<1x512xf32> to vector<4x512xf32>
    %65 = arith.mulf %61, %64 : vector<4x512xf32>
    %66 = vector.extract_strided_slice %2 {offsets = [0, 24], sizes = [4, 4], strides = [1, 1]} : vector<4x36xf32> to vector<4x4xf32>
    %cst_11 = arith.constant dense<0.000000e+00> : vector<4x512xf32>
    %67 = tpu.matmul %66, %65, %cst_11 {dimension_numbers = #tpu.dot_dimension_numbers<[1], [0], [0], [1], [0, 0, 1, 1], [], []>} : vector<4x4xf32>, vector<4x512xf32>, vector<4x512xf32> -> vector<4x512xf32>
    %68 = arith.addf %58, %67 : vector<4x512xf32>
    %69 = vector.extract_strided_slice %1 {offsets = [0, 16], sizes = [4, 496], strides = [1, 1]} : vector<4x512xf32> to vector<4x496xf32>
    %70 = vector.extract_strided_slice %1 {offsets = [0, 0], sizes = [4, 16], strides = [1, 1]} : vector<4x512xf32> to vector<4x16xf32>
    %71 = tpu.concatenate %69, %70 in 1 : vector<4x496xf32>, vector<4x16xf32> -> vector<4x512xf32>
    %72 = vector.extract_strided_slice %0 {offsets = [7, 0, 0], sizes = [1, 1, 512], strides = [1, 1, 1]} : vector<9x1x512xf32> to vector<1x1x512xf32>
    %73 = vector.shape_cast %72 : vector<1x1x512xf32> to vector<1x512xf32>
    %74 = vector.broadcast %73 : vector<1x512xf32> to vector<4x512xf32>
    %75 = arith.mulf %71, %74 : vector<4x512xf32>
    %76 = vector.extract_strided_slice %2 {offsets = [0, 28], sizes = [4, 4], strides = [1, 1]} : vector<4x36xf32> to vector<4x4xf32>
    %cst_12 = arith.constant dense<0.000000e+00> : vector<4x512xf32>
    %77 = tpu.matmul %76, %75, %cst_12 {dimension_numbers = #tpu.dot_dimension_numbers<[1], [0], [0], [1], [0, 0, 1, 1], [], []>} : vector<4x4xf32>, vector<4x512xf32>, vector<4x512xf32> -> vector<4x512xf32>
    %78 = arith.addf %68, %77 : vector<4x512xf32>
    %79 = vector.extract_strided_slice %1 {offsets = [0, 17], sizes = [4, 495], strides = [1, 1]} : vector<4x512xf32> to vector<4x495xf32>
    %80 = vector.extract_strided_slice %1 {offsets = [0, 0], sizes = [4, 17], strides = [1, 1]} : vector<4x512xf32> to vector<4x17xf32>
    %81 = tpu.concatenate %79, %80 in 1 : vector<4x495xf32>, vector<4x17xf32> -> vector<4x512xf32>
    %82 = vector.extract_strided_slice %0 {offsets = [8, 0, 0], sizes = [1, 1, 512], strides = [1, 1, 1]} : vector<9x1x512xf32> to vector<1x1x512xf32>
    %83 = vector.shape_cast %82 : vector<1x1x512xf32> to vector<1x512xf32>
    %84 = vector.broadcast %83 : vector<1x512xf32> to vector<4x512xf32>
    %85 = arith.mulf %81, %84 : vector<4x512xf32>
    %86 = vector.extract_strided_slice %2 {offsets = [0, 32], sizes = [4, 4], strides = [1, 1]} : vector<4x36xf32> to vector<4x4xf32>
    %cst_13 = arith.constant dense<0.000000e+00> : vector<4x512xf32>
    %87 = tpu.matmul %86, %85, %cst_13 {dimension_numbers = #tpu.dot_dimension_numbers<[1], [0], [0], [1], [0, 0, 1, 1], [], []>} : vector<4x4xf32>, vector<4x512xf32>, vector<4x512xf32> -> vector<4x512xf32>
    %88 = arith.addf %78, %87 : vector<4x512xf32>
    %c0_14 = arith.constant 0 : index
    %c0_15 = arith.constant 0 : index
    %89 = vector.load %arg3[%c0_14, %c0_15] : memref<4x1xf32, #tpu.memory_space<vmem>>, vector<4x1xf32>
    %c0_16 = arith.constant 0 : index
    %c0_17 = arith.constant 0 : index
    %90 = vector.load %arg4[%c0_16, %c0_17] : memref<4x1xf32, #tpu.memory_space<vmem>>, vector<4x1xf32>
    %cst_18 = arith.constant dense<0.000000e+00> : vector<4xf32>
    %91 = vector.multi_reduction <add>, %88, %cst_18 [1] : vector<4x512xf32> to vector<4xf32>
    %92 = vector.shape_cast %91 : vector<4xf32> to vector<4x1xf32>
    %cst_19 = arith.constant 0.001953125 : f32
    %93 = vector.broadcast %cst_19 : f32 to vector<4x1xf32>
    %94 = arith.mulf %92, %93 : vector<4x1xf32>
    %95 = arith.mulf %88, %88 : vector<4x512xf32>
    %cst_20 = arith.constant dense<0.000000e+00> : vector<4xf32>
    %96 = vector.multi_reduction <add>, %95, %cst_20 [1] : vector<4x512xf32> to vector<4xf32>
    %97 = vector.shape_cast %96 : vector<4xf32> to vector<4x1xf32>
    %cst_21 = arith.constant 0.001953125 : f32
    %98 = vector.broadcast %cst_21 : f32 to vector<4x1xf32>
    %99 = arith.mulf %97, %98 : vector<4x1xf32>
    %100 = arith.mulf %94, %94 : vector<4x1xf32>
    %101 = arith.subf %99, %100 : vector<4x1xf32>
    %cst_22 = arith.constant 9.99999974E-6 : f32
    %102 = vector.broadcast %cst_22 : f32 to vector<4x1xf32>
    %103 = arith.addf %101, %102 : vector<4x1xf32>
    %104 = math.rsqrt %103 : vector<4x1xf32>
    %105 = arith.mulf %89, %104 : vector<4x1xf32>
    %106 = arith.mulf %94, %105 : vector<4x1xf32>
    %107 = arith.subf %90, %106 : vector<4x1xf32>
    %108 = vector.broadcast %105 : vector<4x1xf32> to vector<4x512xf32>
    %109 = arith.mulf %88, %108 : vector<4x512xf32>
    %110 = vector.broadcast %107 : vector<4x1xf32> to vector<4x512xf32>
    %111 = arith.addf %109, %110 : vector<4x512xf32>
    %cst_23 = arith.constant 0.000000e+00 : f32
    %112 = vector.broadcast %cst_23 : f32 to vector<4x512xf32>
    %113 = arith.maximumf %111, %112 : vector<4x512xf32>
    %c0_24 = arith.constant 0 : index
    %c0_25 = arith.constant 0 : index
    %114 = vector.load %arg5[%c0_24, %c0_25] : memref<4x36xf32, #tpu.memory_space<vmem>>, vector<4x36xf32>
    %115 = vector.extract_strided_slice %113 {offsets = [0, 495], sizes = [4, 17], strides = [1, 1]} : vector<4x512xf32> to vector<4x17xf32>
    %116 = vector.extract_strided_slice %113 {offsets = [0, 0], sizes = [4, 495], strides = [1, 1]} : vector<4x512xf32> to vector<4x495xf32>
    %117 = tpu.concatenate %115, %116 in 1 : vector<4x17xf32>, vector<4x495xf32> -> vector<4x512xf32>
    %118 = vector.extract_strided_slice %0 {offsets = [0, 0, 0], sizes = [1, 1, 512], strides = [1, 1, 1]} : vector<9x1x512xf32> to vector<1x1x512xf32>
    %119 = vector.shape_cast %118 : vector<1x1x512xf32> to vector<1x512xf32>
    %120 = vector.broadcast %119 : vector<1x512xf32> to vector<4x512xf32>
    %121 = arith.mulf %117, %120 : vector<4x512xf32>
    %122 = vector.extract_strided_slice %114 {offsets = [0, 0], sizes = [4, 4], strides = [1, 1]} : vector<4x36xf32> to vector<4x4xf32>
    %cst_26 = arith.constant dense<0.000000e+00> : vector<4x512xf32>
    %123 = tpu.matmul %122, %121, %cst_26 {dimension_numbers = #tpu.dot_dimension_numbers<[1], [0], [0], [1], [0, 0, 1, 1], [], []>} : vector<4x4xf32>, vector<4x512xf32>, vector<4x512xf32> -> vector<4x512xf32>
    %124 = vector.extract_strided_slice %113 {offsets = [0, 496], sizes = [4, 16], strides = [1, 1]} : vector<4x512xf32> to vector<4x16xf32>
    %125 = vector.extract_strided_slice %113 {offsets = [0, 0], sizes = [4, 496], strides = [1, 1]} : vector<4x512xf32> to vector<4x496xf32>
    %126 = tpu.concatenate %124, %125 in 1 : vector<4x16xf32>, vector<4x496xf32> -> vector<4x512xf32>
    %127 = vector.extract_strided_slice %0 {offsets = [1, 0, 0], sizes = [1, 1, 512], strides = [1, 1, 1]} : vector<9x1x512xf32> to vector<1x1x512xf32>
    %128 = vector.shape_cast %127 : vector<1x1x512xf32> to vector<1x512xf32>
    %129 = vector.broadcast %128 : vector<1x512xf32> to vector<4x512xf32>
    %130 = arith.mulf %126, %129 : vector<4x512xf32>
    %131 = vector.extract_strided_slice %114 {offsets = [0, 4], sizes = [4, 4], strides = [1, 1]} : vector<4x36xf32> to vector<4x4xf32>
    %cst_27 = arith.constant dense<0.000000e+00> : vector<4x512xf32>
    %132 = tpu.matmul %131, %130, %cst_27 {dimension_numbers = #tpu.dot_dimension_numbers<[1], [0], [0], [1], [0, 0, 1, 1], [], []>} : vector<4x4xf32>, vector<4x512xf32>, vector<4x512xf32> -> vector<4x512xf32>
    %133 = arith.addf %123, %132 : vector<4x512xf32>
    %134 = vector.extract_strided_slice %113 {offsets = [0, 497], sizes = [4, 15], strides = [1, 1]} : vector<4x512xf32> to vector<4x15xf32>
    %135 = vector.extract_strided_slice %113 {offsets = [0, 0], sizes = [4, 497], strides = [1, 1]} : vector<4x512xf32> to vector<4x497xf32>
    %136 = tpu.concatenate %134, %135 in 1 : vector<4x15xf32>, vector<4x497xf32> -> vector<4x512xf32>
    %137 = vector.extract_strided_slice %0 {offsets = [2, 0, 0], sizes = [1, 1, 512], strides = [1, 1, 1]} : vector<9x1x512xf32> to vector<1x1x512xf32>
    %138 = vector.shape_cast %137 : vector<1x1x512xf32> to vector<1x512xf32>
    %139 = vector.broadcast %138 : vector<1x512xf32> to vector<4x512xf32>
    %140 = arith.mulf %136, %139 : vector<4x512xf32>
    %141 = vector.extract_strided_slice %114 {offsets = [0, 8], sizes = [4, 4], strides = [1, 1]} : vector<4x36xf32> to vector<4x4xf32>
    %cst_28 = arith.constant dense<0.000000e+00> : vector<4x512xf32>
    %142 = tpu.matmul %141, %140, %cst_28 {dimension_numbers = #tpu.dot_dimension_numbers<[1], [0], [0], [1], [0, 0, 1, 1], [], []>} : vector<4x4xf32>, vector<4x512xf32>, vector<4x512xf32> -> vector<4x512xf32>
    %143 = arith.addf %133, %142 : vector<4x512xf32>
    %144 = vector.extract_strided_slice %113 {offsets = [0, 511], sizes = [4, 1], strides = [1, 1]} : vector<4x512xf32> to vector<4x1xf32>
    %145 = vector.extract_strided_slice %113 {offsets = [0, 0], sizes = [4, 511], strides = [1, 1]} : vector<4x512xf32> to vector<4x511xf32>
    %146 = tpu.concatenate %144, %145 in 1 : vector<4x1xf32>, vector<4x511xf32> -> vector<4x512xf32>
    %147 = vector.extract_strided_slice %0 {offsets = [3, 0, 0], sizes = [1, 1, 512], strides = [1, 1, 1]} : vector<9x1x512xf32> to vector<1x1x512xf32>
    %148 = vector.shape_cast %147 : vector<1x1x512xf32> to vector<1x512xf32>
    %149 = vector.broadcast %148 : vector<1x512xf32> to vector<4x512xf32>
    %150 = arith.mulf %146, %149 : vector<4x512xf32>
    %151 = vector.extract_strided_slice %114 {offsets = [0, 12], sizes = [4, 4], strides = [1, 1]} : vector<4x36xf32> to vector<4x4xf32>
    %cst_29 = arith.constant dense<0.000000e+00> : vector<4x512xf32>
    %152 = tpu.matmul %151, %150, %cst_29 {dimension_numbers = #tpu.dot_dimension_numbers<[1], [0], [0], [1], [0, 0, 1, 1], [], []>} : vector<4x4xf32>, vector<4x512xf32>, vector<4x512xf32> -> vector<4x512xf32>
    %153 = arith.addf %143, %152 : vector<4x512xf32>
    %154 = vector.extract_strided_slice %0 {offsets = [4, 0, 0], sizes = [1, 1, 512], strides = [1, 1, 1]} : vector<9x1x512xf32> to vector<1x1x512xf32>
    %155 = vector.shape_cast %154 : vector<1x1x512xf32> to vector<1x512xf32>
    %156 = vector.broadcast %155 : vector<1x512xf32> to vector<4x512xf32>
    %157 = arith.mulf %113, %156 : vector<4x512xf32>
    %158 = vector.extract_strided_slice %114 {offsets = [0, 16], sizes = [4, 4], strides = [1, 1]} : vector<4x36xf32> to vector<4x4xf32>
    %cst_30 = arith.constant dense<0.000000e+00> : vector<4x512xf32>
    %159 = tpu.matmul %158, %157, %cst_30 {dimension_numbers = #tpu.dot_dimension_numbers<[1], [0], [0], [1], [0, 0, 1, 1], [], []>} : vector<4x4xf32>, vector<4x512xf32>, vector<4x512xf32> -> vector<4x512xf32>
    %160 = arith.addf %153, %159 : vector<4x512xf32>
    %161 = vector.extract_strided_slice %113 {offsets = [0, 1], sizes = [4, 511], strides = [1, 1]} : vector<4x512xf32> to vector<4x511xf32>
    %162 = vector.extract_strided_slice %113 {offsets = [0, 0], sizes = [4, 1], strides = [1, 1]} : vector<4x512xf32> to vector<4x1xf32>
    %163 = tpu.concatenate %161, %162 in 1 : vector<4x511xf32>, vector<4x1xf32> -> vector<4x512xf32>
    %164 = vector.extract_strided_slice %0 {offsets = [5, 0, 0], sizes = [1, 1, 512], strides = [1, 1, 1]} : vector<9x1x512xf32> to vector<1x1x512xf32>
    %165 = vector.shape_cast %164 : vector<1x1x512xf32> to vector<1x512xf32>
    %166 = vector.broadcast %165 : vector<1x512xf32> to vector<4x512xf32>
    %167 = arith.mulf %163, %166 : vector<4x512xf32>
    %168 = vector.extract_strided_slice %114 {offsets = [0, 20], sizes = [4, 4], strides = [1, 1]} : vector<4x36xf32> to vector<4x4xf32>
    %cst_31 = arith.constant dense<0.000000e+00> : vector<4x512xf32>
    %169 = tpu.matmul %168, %167, %cst_31 {dimension_numbers = #tpu.dot_dimension_numbers<[1], [0], [0], [1], [0, 0, 1, 1], [], []>} : vector<4x4xf32>, vector<4x512xf32>, vector<4x512xf32> -> vector<4x512xf32>
    %170 = arith.addf %160, %169 : vector<4x512xf32>
    %171 = vector.extract_strided_slice %113 {offsets = [0, 15], sizes = [4, 497], strides = [1, 1]} : vector<4x512xf32> to vector<4x497xf32>
    %172 = vector.extract_strided_slice %113 {offsets = [0, 0], sizes = [4, 15], strides = [1, 1]} : vector<4x512xf32> to vector<4x15xf32>
    %173 = tpu.concatenate %171, %172 in 1 : vector<4x497xf32>, vector<4x15xf32> -> vector<4x512xf32>
    %174 = vector.extract_strided_slice %0 {offsets = [6, 0, 0], sizes = [1, 1, 512], strides = [1, 1, 1]} : vector<9x1x512xf32> to vector<1x1x512xf32>
    %175 = vector.shape_cast %174 : vector<1x1x512xf32> to vector<1x512xf32>
    %176 = vector.broadcast %175 : vector<1x512xf32> to vector<4x512xf32>
    %177 = arith.mulf %173, %176 : vector<4x512xf32>
    %178 = vector.extract_strided_slice %114 {offsets = [0, 24], sizes = [4, 4], strides = [1, 1]} : vector<4x36xf32> to vector<4x4xf32>
    %cst_32 = arith.constant dense<0.000000e+00> : vector<4x512xf32>
    %179 = tpu.matmul %178, %177, %cst_32 {dimension_numbers = #tpu.dot_dimension_numbers<[1], [0], [0], [1], [0, 0, 1, 1], [], []>} : vector<4x4xf32>, vector<4x512xf32>, vector<4x512xf32> -> vector<4x512xf32>
    %180 = arith.addf %170, %179 : vector<4x512xf32>
    %181 = vector.extract_strided_slice %113 {offsets = [0, 16], sizes = [4, 496], strides = [1, 1]} : vector<4x512xf32> to vector<4x496xf32>
    %182 = vector.extract_strided_slice %113 {offsets = [0, 0], sizes = [4, 16], strides = [1, 1]} : vector<4x512xf32> to vector<4x16xf32>
    %183 = tpu.concatenate %181, %182 in 1 : vector<4x496xf32>, vector<4x16xf32> -> vector<4x512xf32>
    %184 = vector.extract_strided_slice %0 {offsets = [7, 0, 0], sizes = [1, 1, 512], strides = [1, 1, 1]} : vector<9x1x512xf32> to vector<1x1x512xf32>
    %185 = vector.shape_cast %184 : vector<1x1x512xf32> to vector<1x512xf32>
    %186 = vector.broadcast %185 : vector<1x512xf32> to vector<4x512xf32>
    %187 = arith.mulf %183, %186 : vector<4x512xf32>
    %188 = vector.extract_strided_slice %114 {offsets = [0, 28], sizes = [4, 4], strides = [1, 1]} : vector<4x36xf32> to vector<4x4xf32>
    %cst_33 = arith.constant dense<0.000000e+00> : vector<4x512xf32>
    %189 = tpu.matmul %188, %187, %cst_33 {dimension_numbers = #tpu.dot_dimension_numbers<[1], [0], [0], [1], [0, 0, 1, 1], [], []>} : vector<4x4xf32>, vector<4x512xf32>, vector<4x512xf32> -> vector<4x512xf32>
    %190 = arith.addf %180, %189 : vector<4x512xf32>
    %191 = vector.extract_strided_slice %113 {offsets = [0, 17], sizes = [4, 495], strides = [1, 1]} : vector<4x512xf32> to vector<4x495xf32>
    %192 = vector.extract_strided_slice %113 {offsets = [0, 0], sizes = [4, 17], strides = [1, 1]} : vector<4x512xf32> to vector<4x17xf32>
    %193 = tpu.concatenate %191, %192 in 1 : vector<4x495xf32>, vector<4x17xf32> -> vector<4x512xf32>
    %194 = vector.extract_strided_slice %0 {offsets = [8, 0, 0], sizes = [1, 1, 512], strides = [1, 1, 1]} : vector<9x1x512xf32> to vector<1x1x512xf32>
    %195 = vector.shape_cast %194 : vector<1x1x512xf32> to vector<1x512xf32>
    %196 = vector.broadcast %195 : vector<1x512xf32> to vector<4x512xf32>
    %197 = arith.mulf %193, %196 : vector<4x512xf32>
    %198 = vector.extract_strided_slice %114 {offsets = [0, 32], sizes = [4, 4], strides = [1, 1]} : vector<4x36xf32> to vector<4x4xf32>
    %cst_34 = arith.constant dense<0.000000e+00> : vector<4x512xf32>
    %199 = tpu.matmul %198, %197, %cst_34 {dimension_numbers = #tpu.dot_dimension_numbers<[1], [0], [0], [1], [0, 0, 1, 1], [], []>} : vector<4x4xf32>, vector<4x512xf32>, vector<4x512xf32> -> vector<4x512xf32>
    %200 = arith.addf %190, %199 : vector<4x512xf32>
    %c0_35 = arith.constant 0 : index
    %c0_36 = arith.constant 0 : index
    %201 = vector.load %arg6[%c0_35, %c0_36] : memref<4x1xf32, #tpu.memory_space<vmem>>, vector<4x1xf32>
    %c0_37 = arith.constant 0 : index
    %c0_38 = arith.constant 0 : index
    %202 = vector.load %arg7[%c0_37, %c0_38] : memref<4x1xf32, #tpu.memory_space<vmem>>, vector<4x1xf32>
    %cst_39 = arith.constant dense<0.000000e+00> : vector<4xf32>
    %203 = vector.multi_reduction <add>, %200, %cst_39 [1] : vector<4x512xf32> to vector<4xf32>
    %204 = vector.shape_cast %203 : vector<4xf32> to vector<4x1xf32>
    %cst_40 = arith.constant 0.001953125 : f32
    %205 = vector.broadcast %cst_40 : f32 to vector<4x1xf32>
    %206 = arith.mulf %204, %205 : vector<4x1xf32>
    %207 = arith.mulf %200, %200 : vector<4x512xf32>
    %cst_41 = arith.constant dense<0.000000e+00> : vector<4xf32>
    %208 = vector.multi_reduction <add>, %207, %cst_41 [1] : vector<4x512xf32> to vector<4xf32>
    %209 = vector.shape_cast %208 : vector<4xf32> to vector<4x1xf32>
    %cst_42 = arith.constant 0.001953125 : f32
    %210 = vector.broadcast %cst_42 : f32 to vector<4x1xf32>
    %211 = arith.mulf %209, %210 : vector<4x1xf32>
    %212 = arith.mulf %206, %206 : vector<4x1xf32>
    %213 = arith.subf %211, %212 : vector<4x1xf32>
    %cst_43 = arith.constant 9.99999974E-6 : f32
    %214 = vector.broadcast %cst_43 : f32 to vector<4x1xf32>
    %215 = arith.addf %213, %214 : vector<4x1xf32>
    %216 = math.rsqrt %215 : vector<4x1xf32>
    %217 = arith.mulf %201, %216 : vector<4x1xf32>
    %218 = arith.mulf %206, %217 : vector<4x1xf32>
    %219 = arith.subf %202, %218 : vector<4x1xf32>
    %220 = vector.broadcast %217 : vector<4x1xf32> to vector<4x512xf32>
    %221 = arith.mulf %200, %220 : vector<4x512xf32>
    %222 = vector.broadcast %219 : vector<4x1xf32> to vector<4x512xf32>
    %223 = arith.addf %221, %222 : vector<4x512xf32>
    %224 = arith.addf %223, %1 : vector<4x512xf32>
    %cst_44 = arith.constant 0.000000e+00 : f32
    %225 = vector.broadcast %cst_44 : f32 to vector<4x512xf32>
    %226 = arith.maximumf %224, %225 : vector<4x512xf32>
    %c0_45 = arith.constant 0 : index
    %c0_46 = arith.constant 0 : index
    %227 = vector.load %arg8[%c0_45, %c0_46] : memref<4x512xf32, #tpu.memory_space<vmem>>, vector<4x512xf32>
    tpu.vector_store %arg8[%c0_45, %c0_46], %226 {strides = array<i32>} : memref<4x512xf32, #tpu.memory_space<vmem>>, vector<4x512xf32>,
    return
  }
}

</mosaic_0001>

<bundles_post_ra>
// kernel: tpu_custom_call.1
= control target key start
LH: loop header
LB: loop body
LE: loop exit
PB: predicated region body
PF: predicated region fallthrough
CT: control target
= control target key end

     0   :  { %13 = vsyncpa [#allocation3], 0  ;;  %s3621_s0 = inlined_call_operand.hbm [shape: f32[4,512], index: 0, kind: input, shape index: {}]   ;;  %s3622_s1 = inlined_call_operand.hbm [shape: f32[9,1,512], index: 1, kind: input, shape index: {}]   ;;  %s3623_s2 = inlined_call_operand.vmem [shape: f32[4,36], index: 2, kind: input, shape index: {}]   ;;  %s3624_s3 = inlined_call_operand.vmem [shape: f32[4,1], index: 3, kind: input, shape index: {}]   ;;  %s3625_s4 = inlined_call_operand.vmem [shape: f32[4,1], index: 4, kind: input, shape index: {}]   ;;  %s3626_s5 = inlined_call_operand.vmem [shape: f32[4,36], index: 5, kind: input, shape index: {}]   ;;  %s3627_s6 = inlined_call_operand.vmem [shape: f32[4,1], index: 6, kind: input, shape index: {}]   ;;  %s3628_s7 = inlined_call_operand.vmem [shape: f32[4,1], index: 7, kind: input, shape index: {}]   ;;  %s3629_s8 = inlined_call_operand.hbm [shape: f32[4,512], index: 8, kind: output, shape index: {}]  }
   0x1   :  { %14 = vsyncpa [#allocation6], 0 }
   0x2   :  { %15 = vsyncpa [#allocation4], 0  ;;  %s21_s29 = sshll.u32 %s3621_s0, 4  ;;  %s2815_s30 = smov [#allocation2]   ;;  %s22_s29 = int_to_ptr.hbm [resolvable:$true] %s21_s29 }
   0x3   :  { %s23_s9 = sshll.u32 %s2815_s30, 4  ;;  %s31_s12 = sshll.u32 %s3622_s1, 4  ;;  %s24_s9 = int_to_ptr.vmem [resolvable:$true] %s23_s9  ;;  %s32_s12 = int_to_ptr.hbm [resolvable:$true] %s31_s12 }
   0x4   :  { %26 = dma.hbm_to_vmem [thread:$0]  %s22_s29, 256, %s24_s9, [#allocation3]  }
   0x5   :  { %s2816_s13 = smov [#allocation5]   ;;  %s2817_s15 = smov 64  }
   0x6   :  { %s33_s14 = sshll.u32 %s2816_s13, 4  ;;  %s2818_s16 = smov 4   ;;  %s34_s14 = int_to_ptr.vmem [resolvable:$true] %s33_s14 }
   0x7   :  { %39 = dma.hbm_to_vmem [thread:$0]  %s32_s12, 576, %s34_s14, [#allocation6], %s2817_s15, %s2817_s15, %s2818_s16  }
   0x8   :  { %2809 = dma.done.wait [#allocation3], 256  }
   0x9   :  { %2810 = vsyncadd [#allocation3], 4294967040 }
   0xa   :  { %2811 = dma.done.wait [#allocation6], 576  }
   0xb   :  { %2812 = vsyncadd [#allocation6], 4294966720  ;;  %v2887_v0 = vld [vmem:[#allocation2 + $0x8] sm:$0xff]  ;;  %v2892_v1 = vld [vmem:[%s3623_s2] sm:$0xf]  ;;  %s2819_s1 = smov 124  }
   0xc   :  { %81 = vst [vmem:[#allocation1 + $0x10] ss:$2 sm:$0xff] %v2887_v0  ;;  %159 = vrot.lane.b32.xlu2 %v2892_v1, %s2819_s1  ;;  %v2898_v2 = vld [vmem:[#allocation2] sm:$0xff]  ;;  %s2820_s18 = smov 17   ;;  %s2821_s2 = smov 16   ;;  %vm164_vm0 = vcmask 1043456  }
   0xd   :  { %73 = vst [vmem:[#allocation1] ss:$2 sm:$0xff] %v2887_v0  ;;  %v2905_v6 = vld [vmem:[#allocation5 + $0x10] sm:$0xf]  ;;  %s2822_s19 = smov 15   ;;  %s2823_s20 = smov 112  }
   0xe   :  { %v3644_v11 = vperm.slane %v2905_v6, 3  ;;  %v3645_v12 = vperm.slane %v2905_v6, 2  ;;  %s2824_s21 = smov 120   ;;  %s2825_s22 = smov 1   ;;  %v3650_v30 = vperm.slane %v2905_v6, 1  ;;  %v3651_v31 = vperm.slane %v2905_v6, 0 }
   0xf   :  { %s2826_s23 = smov 116   ;;  %s2827_s24 = smov 127   ;;  %v2999_v60 = vld [vmem:[#allocation5 + $0x4] sm:$0xf]  ;;  %vm94_vm1 = vcmask 138240   ;;  %vm136_vm2 = vcmask 130048  }
  0x10   :  { %v645_v13 = vrot.slane %v3644_v11, 4  ;;  %v644_v32 = vrot.slane %v3650_v30, 4  ;;  %s2828_s25 = smov 108   ;;  %s2829_s26 = smov 113   ;;  %v3001_v61 = vld [vmem:[#allocation5] sm:$0xf] }
  0x11   :  { %s2830_s27 = smov 104   ;;  %s2831_s28 = smov 100   ;;  %v149_v62 = vperm.slane %v2999_v60, 3  ;;  %vm161_vm3 = vcmask 31744   ;;  %vm371_vm4 = vcmask 121856   ;;  %vm513_vm5 = vcmask 7168  }
  0x12   :  { %v647_v17 = vsel %vm164_vm0, %v3645_v12, %v645_v13  ;;  %v646_v36 = vsel %vm164_vm0, %v3651_v31, %v644_v32  ;;  %s2832_s29 = smov 111   ;;  %s2833_s30 = smov 96   ;;  %v147_v32 = vperm.slane %v2999_v60, 1  ;;  %vm772_vm6 = vcmask 1039360  }
  0x13   :  { %v84_v3 = vld.sshfl [vmem:[#allocation1 + $0x10] sm:$0xff pattern:$0x75316420]  ;;  %v85_v4 = vld.sshfl [vmem:[#allocation1 + $0x18] sm:$0xff pattern:$0x75316420]  ;;  %v651_v18 = vmul.f32 %v647_v17, %v2887_v0  ;;  %v650_v37 = vmul.f32 %v646_v36, %v2898_v2 }
  0x14   :  { %90 = vrot.lane.b32.xlu1 %v84_v3, %s2820_s18  ;;  %123 = vst [vmem:[#allocation1 + $0x10] ss:$2 sm:$0xff] %v2887_v0  ;;  %v74_v5 = vld.sshfl [vmem:[#allocation1 + $0x8] sm:$0xff pattern:$0x75316420]  ;;  %92 = vrot.lane.b32.xlu2 %v85_v4, %s2820_s18  ;;  %v3658_v4 = vperm.slane %v3001_v61, 3 }
  0x15   :  { %75 = vrot.lane.b32.xlu0 %v74_v5, %s2820_s18  ;;  %79 = vst [vmem:[#allocation1] ss:$2 sm:$0xff] %v2898_v2  ;;  %v105_v36 = vperm.slane %v3001_v61, 1  ;;  %vm914_vm7 = vcmask 924672   ;;  %vm1056_vm8 = vcmask 916480   ;;  %vm1198_vm9 = vcmask 908288  }
  0x16   :  { %s2555_s17 = sshll.u32 %s3629_s8, 4  ;;  %s2556_s17 = int_to_ptr.hbm [resolvable:$true] %s2555_s17 }
  0x1b   :  { %v127_v7 = vld.sshfl [vmem:[#allocation1 + $0x18] sm:$0xff pattern:$0x75316420]  ;;  %v126_v8 = vld.sshfl [vmem:[#allocation1 + $0x10] sm:$0xff pattern:$0x75316420] }
  0x1c   :  { %134 = vrot.lane.b32.xlu1 %v127_v7, %s2821_s2  ;;  %358 = vst [vmem:[#allocation1 + $0x10] ss:$2 sm:$0xff] %v2887_v0  ;;  %v83_v9 = vld.sshfl [vmem:[#allocation1 + $0x8] sm:$0xff pattern:$0x75316420] }
  0x1d   :  { %132 = vrot.lane.b32.xlu0 %v126_v8, %s2821_s2  ;;  %v82_v10 = vld.sshfl [vmem:[#allocation1] sm:$0xff pattern:$0x75316420] }
  0x1e   :  { %116 = vst [vmem:[#allocation1] ss:$2 sm:$0xff] %v2887_v0 }
  0x23   :  { %v361_v14 = vld.sshfl [vmem:[#allocation1 + $0x10] sm:$0xff pattern:$0x75316420]  ;;  %v362_v15 = vld.sshfl [vmem:[#allocation1 + $0x18] sm:$0xff pattern:$0x75316420] }
  0x24   :  { %86 = vrot.lane.b32.xlu1 %v82_v10, %s2820_s18  ;;  %500 = vst [vmem:[#allocation1 + $0x10] ss:$2 sm:$0xff] %v2887_v0 }
  0x25   :  { %88 = vrot.lane.b32.xlu0 %v83_v9, %s2820_s18  ;;  %v117_v16 = vld.sshfl [vmem:[#allocation1 + $0x8] sm:$0xff pattern:$0x75316420] }
  0x26   :  { %121 = vst [vmem:[#allocation1] ss:$2 sm:$0xff] %v2898_v2 }
  0x2b   :  { %v503_v19 = vld.sshfl [vmem:[#allocation1 + $0x10] sm:$0xff pattern:$0x75316420]  ;;  %v504_v20 = vld.sshfl [vmem:[#allocation1 + $0x18] sm:$0xff pattern:$0x75316420] }
  0x2c   :  { %118 = vrot.lane.b32.xlu1 %v117_v16, %s2821_s2  ;;  %658 = vst [vmem:[#allocation1 + $0x10] ss:$2 sm:$0xff] %v651_v18  ;;  %v146_v18 = vperm.slane %v2999_v60, 0 }
  0x2d   :  { %367 = vrot.lane.b32.xlu0 %v361_v14, %s2822_s19  ;;  %v124_v21 = vld.sshfl [vmem:[#allocation1] sm:$0xff pattern:$0x75316420]  ;;  %v125_v22 = vld.sshfl [vmem:[#allocation1 + $0x8] sm:$0xff pattern:$0x75316420] }
  0x2e   :  { %128 = vrot.lane.b32.xlu2 %v124_v21, %s2821_s2  ;;  %351 = vst [vmem:[#allocation1] ss:$2 sm:$0xff] %v2887_v0 }
  0x33   :  { %v2927_v23 = vld.sshfl [vmem:[#allocation1 + $0x10] sm:$0xff pattern:$0x75316420]  ;;  %v2929_v24 = vld.sshfl [vmem:[#allocation1 + $0x18] sm:$0xff pattern:$0x75316420] }
  0x34   :  { %369 = vrot.lane.b32.xlu1 %v362_v15, %s2822_s19  ;;  %759 = vst [vmem:[#allocation1 + $0x10] ss:$2 sm:$0xff] %v2887_v0 }
  0x35   :  { %130 = vrot.lane.b32.xlu0 %v125_v22, %s2821_s2  ;;  %v352_v25 = vld.sshfl [vmem:[#allocation1 + $0x8] sm:$0xff pattern:$0x75316420] }
  0x36   :  { %652 = vrot.lane.b32.xlu2 %v2892_v1, %s2823_s20  ;;  %356 = vst [vmem:[#allocation1] ss:$2 sm:$0xff] %v2898_v2 }
  0x3b   :  { %v762_v26 = vld.sshfl [vmem:[#allocation1 + $0x10] sm:$0xff pattern:$0x75316420]  ;;  %v763_v27 = vld.sshfl [vmem:[#allocation1 + $0x18] sm:$0xff pattern:$0x75316420] }
  0x3c   :  { %393 = vrot.lane.b32.xlu1 %v2892_v1, %s2824_s21  ;;  %901 = vst [vmem:[#allocation1 + $0x10] ss:$2 sm:$0xff] %v2887_v0 }
  0x3d   :  { %509 = vrot.lane.b32.xlu0 %v503_v19, %s2825_s22  ;;  %v360_v28 = vld.sshfl [vmem:[#allocation1 + $0x8] sm:$0xff pattern:$0x75316420]  ;;  %v359_v29 = vld.sshfl [vmem:[#allocation1] sm:$0xff pattern:$0x75316420] }
  0x3e   :  { %353 = vrot.lane.b32.xlu2 %v352_v25, %s2822_s19  ;;  %493 = vst [vmem:[#allocation1] ss:$2 sm:$0xff] %v2887_v0  ;;  %v104_v19 = vperm.slane %v3001_v61, 0 }
  0x43   :  { %v904_v33 = vld.sshfl [vmem:[#allocation1 + $0x10] sm:$0xff pattern:$0x75316420]  ;;  %v905_v34 = vld.sshfl [vmem:[#allocation1 + $0x18] sm:$0xff pattern:$0x75316420] }
  0x44   :  { %511 = vrot.lane.b32.xlu1 %v504_v20, %s2825_s22  ;;  %1043 = vst [vmem:[#allocation1 + $0x10] ss:$2 sm:$0xff] %v2887_v0 }
  0x45   :  { %363 = vrot.lane.b32.xlu0 %v359_v29, %s2822_s19  ;;  %v494_v35 = vld.sshfl [vmem:[#allocation1 + $0x8] sm:$0xff pattern:$0x75316420] }
  0x46   :  { %365 = vrot.lane.b32.xlu2 %v360_v28, %s2822_s19  ;;  %498 = vst [vmem:[#allocation1] ss:$2 sm:$0xff] %v2898_v2  ;;  %v3037_v28 = vld [vmem:[#allocation5 + $0x8] sm:$0xf] }
  0x47   :  { %v3657_v29 = vperm.slane %v3037_v28, 3 }
  0x4b   :  { %v1047_v38 = vld.sshfl [vmem:[#allocation1 + $0x18] sm:$0xff pattern:$0x75316420]  ;;  %v1046_v39 = vld.sshfl [vmem:[#allocation1 + $0x10] sm:$0xff pattern:$0x75316420] }
  0x4c   :  { %535 = vrot.lane.b32.xlu1 %v2892_v1, %s2826_s23  ;;  %1185 = vst [vmem:[#allocation1 + $0x10] ss:$2 sm:$0xff] %v2887_v0 }
  0x4d   :  { %768 = vrot.lane.b32.xlu0 %v762_v26, %s2827_s24  ;;  %v501_v40 = vld.sshfl [vmem:[#allocation1] sm:$0xff pattern:$0x75316420]  ;;  %v502_v41 = vld.sshfl [vmem:[#allocation1 + $0x8] sm:$0xff pattern:$0x75316420] }
  0x4e   :  { %799 = vrot.lane.b32.xlu2 %v2892_v1, %s2828_s25  ;;  %656 = vst [vmem:[#allocation1] ss:$2 sm:$0xff] %v650_v37 }
  0x53   :  { %v1189_v42 = vld.sshfl [vmem:[#allocation1 + $0x18] sm:$0xff pattern:$0x75316420]  ;;  %v1188_v45 = vld.sshfl [vmem:[#allocation1 + $0x10] sm:$0xff pattern:$0x75316420] }
  0x54   :  { %770 = vrot.lane.b32.xlu1 %v763_v27, %s2827_s24  ;;  %2519 = vst [vmem:[#allocation1 + $0x10] ss:$2 sm:$0xff] %v2887_v0 }
  0x55   :  { %910 = vrot.lane.b32.xlu0 %v904_v33, %s2829_s26  ;;  %v2964_v43 = vld.sshfl [vmem:[#allocation1] sm:$0xff pattern:$0x75316420]  ;;  %v2966_v44 = vld.sshfl [vmem:[#allocation1 + $0x8] sm:$0xff pattern:$0x75316420] }
  0x56   :  { %495 = vrot.lane.b32.xlu2 %v494_v35, %s2825_s22  ;;  %757 = vst [vmem:[#allocation1] ss:$2 sm:$0xff] %v2898_v2  ;;  %v148_v33 = vperm.slane %v2999_v60, 2  ;;  %v106_v35 = vperm.slane %v3001_v61, 2 }
  0x5c   :  { %912 = vrot.lane.b32.xlu1 %v905_v34, %s2829_s26 }
  0x5d   :  { %505 = vrot.lane.b32.xlu0 %v501_v40, %s2825_s22  ;;  %v761_v46 = vld.sshfl [vmem:[#allocation1 + $0x8] sm:$0xff pattern:$0x75316420]  ;;  %v760_v47 = vld.sshfl [vmem:[#allocation1] sm:$0xff pattern:$0x75316420] }
  0x5e   :  { %941 = vrot.lane.b32.xlu2 %v2892_v1, %s2830_s27  ;;  %780 = vst [vmem:[#allocation1] ss:$2 sm:$0xff] %v2898_v2 }
  0x64   :  { %1054 = vrot.lane.b32.xlu1 %v1047_v38, %s2823_s20 }
  0x65   :  { %1052 = vrot.lane.b32.xlu0 %v1046_v39, %s2823_s20  ;;  %v781_v48 = vld.sshfl [vmem:[#allocation1] sm:$0xff pattern:$0x75316420] }
  0x66   :  { %507 = vrot.lane.b32.xlu2 %v502_v41, %s2825_s22  ;;  %899 = vst [vmem:[#allocation1] ss:$2 sm:$0xff] %v2898_v2  ;;  %v2986_v51 = vpop.permute.xlu2 %159 }
  0x6c   :  { %766 = vrot.lane.b32.xlu1 %v761_v46, %s2827_s24 }
  0x6d   :  { %764 = vrot.lane.b32.xlu0 %v760_v47, %s2827_s24  ;;  %v903_v49 = vld.sshfl [vmem:[#allocation1 + $0x8] sm:$0xff pattern:$0x75316420]  ;;  %v902_v50 = vld.sshfl [vmem:[#allocation1] sm:$0xff pattern:$0x75316420] }
  0x6e   :  { %1083 = vrot.lane.b32.xlu2 %v2892_v1, %s2831_s28  ;;  %922 = vst [vmem:[#allocation1] ss:$2 sm:$0xff] %v2898_v2  ;;  %v93_v55 = vpop.permute.xlu2 %92  ;;  %v3656_v47 = vperm.slane %v3037_v28, 2 }
  0x74   :  { %1196 = vrot.lane.b32.xlu1 %v1189_v42, %s2832_s29 }
  0x75   :  { %1194 = vrot.lane.b32.xlu0 %v1188_v45, %s2832_s29  ;;  %v923_v52 = vld.sshfl [vmem:[#allocation1] sm:$0xff pattern:$0x75316420] }
  0x76   :  { %782 = vrot.lane.b32.xlu2 %v781_v48, %s2827_s24  ;;  %1041 = vst [vmem:[#allocation1] ss:$2 sm:$0xff] %v2898_v2 }
  0x7c   :  { %908 = vrot.lane.b32.xlu1 %v903_v49, %s2829_s26 }
  0x7d   :  { %906 = vrot.lane.b32.xlu0 %v902_v50, %s2829_s26  ;;  %v1045_v53 = vld.sshfl [vmem:[#allocation1 + $0x8] sm:$0xff pattern:$0x75316420]  ;;  %v1044_v54 = vld.sshfl [vmem:[#allocation1] sm:$0xff pattern:$0x75316420] }
  0x7e   :  { %924 = vrot.lane.b32.xlu2 %v923_v52, %s2829_s26  ;;  %1064 = vst [vmem:[#allocation1] ss:$2 sm:$0xff] %v2898_v2 }
  0x84   :  { %1050 = vrot.lane.b32.xlu1 %v1045_v53, %s2823_s20 }
  0x85   :  { %1048 = vrot.lane.b32.xlu0 %v1044_v54, %s2823_s20  ;;  %v1065_v56 = vld.sshfl [vmem:[#allocation1] sm:$0xff pattern:$0x75316420] }
  0x86   :  { %1066 = vrot.lane.b32.xlu2 %v1065_v56, %s2823_s20  ;;  %1183 = vst [vmem:[#allocation1] ss:$2 sm:$0xff] %v2898_v2  ;;  %v91_v57 = vpop.permute.xlu1 %90 }
  0x87   :  { %v76_v58 = vpop.permute.xlu0 %75  ;;  %v97_v7 = vsel %vm94_vm1, %v91_v57, %v93_v55 }
  0x88   :  { %v129_v59 = vpop.permute.xlu2 %128  ;;  %v115_v13 = vmul.f32 %v3658_v4, %v97_v7 }
  0x8d   :  { %v1187_v63 = vld.sshfl [vmem:[#allocation1 + $0x8] sm:$0xff pattern:$0x75316420]  ;;  %v1186_v0 = vld.sshfl [vmem:[#allocation1] sm:$0xff pattern:$0x75316420] }
  0x8e   :  { %1192 = vrot.lane.b32.xlu1 %v1187_v63, %s2832_s29  ;;  %1190 = vrot.lane.b32.xlu0 %v1186_v0, %s2832_s29  ;;  %1206 = vst [vmem:[#allocation1] ss:$2 sm:$0xff] %v2898_v2  ;;  %v135_v3 = vpop.permute.xlu1 %134  ;;  %v3654_v63 = vperm.slane %v3037_v28, 1 }
  0x8f   :  { %v133_v5 = vpop.permute.xlu0 %132 }
  0x90   :  { %v139_v8 = vsel %vm136_vm2, %v133_v5, %v135_v3  ;;  %v3010_v9 = vpop.permute.xlu2 %652 }
  0x91   :  { %v157_v10 = vmul.f32 %v149_v62, %v139_v8 }
  0x93   :  { %2572 = vmatpush.msk.msra.mxu3 %vm164_vm0, %v157_v10 }
  0x94   :  { %2573 = vmatmul.msk.f32.vlgmr.msra.gmra.mxu3 %vm161_vm3, %v2986_v51 }
  0x95   :  { %2580 = vmatpush.msk.msrb.mxu3 %vm164_vm0, %v115_v13  ;;  %v1207_v14 = vld.sshfl [vmem:[#allocation1] sm:$0xff pattern:$0x75316420] }
  0x96   :  { %1208 = vrot.lane.b32.xlu2 %v1207_v14, %s2832_s29  ;;  %2517 = vst [vmem:[#allocation1] ss:$2 sm:$0xff] %v2898_v2  ;;  %v87_v15 = vpop.permute.xlu1 %86 }
  0x97   :  { %v89_v16 = vpop.permute.xlu0 %88  ;;  %v102_v21 = vsel %vm94_vm1, %v76_v58, %v87_v15  ;;  %v3081_v58 = vld [vmem:[#allocation5 + $0xc] sm:$0xf] }
  0x98   :  { %v3022_v17 = vpop.permute.xlu2 %353  ;;  %v112_v27 = vmul.f32 %v104_v19, %v102_v21  ;;  %v95_v39 = vsel %vm94_vm1, %v87_v15, %v89_v16  ;;  %v96_v46 = vsel %vm94_vm1, %v89_v16, %v91_v57  ;;  %v3649_v16 = vperm.slane %v3081_v58, 2 }
  0x99   :  { %v113_v52 = vmul.f32 %v105_v36, %v95_v39  ;;  %v114_v53 = vmul.f32 %v106_v35, %v96_v46  ;;  %v3653_v39 = vperm.slane %v3081_v58, 0 }
  0x9c   :  { %2581 = vmatmul.msk.f32.vlgmr.msrb.gmra.mxu3 %vm161_vm3, %v2892_v1 }
  0x9e   :  { %1225 = vrot.lane.b32.xlu2 %v2892_v1, %s2833_s30  ;;  %v119_v20 = vpop.permute.xlu1 %118 }
  0x9f   :  { %v368_v22 = vpop.permute.xlu0 %367  ;;  %v144_v2 = vsel %vm136_vm2, %v119_v20, %v129_v59 }
  0xa0   :  { %v366_v25 = vpop.permute.xlu2 %365  ;;  %v154_v26 = vmul.f32 %v146_v18, %v144_v2 }
  0xa1   :  { %v373_v50 = vsel %vm371_vm4, %v366_v25, %v368_v22 }
  0xa2   :  { %2566 = vmatpush.msk.msra.mxu0 %vm164_vm0, %v154_v26  ;;  %v391_v54 = vmul.f32 %v3656_v47, %v373_v50 }
  0xa3   :  { %2567 = vmatmul.msk.f32.vlgmr.msra.gmra.mxu0 %vm161_vm3, %v2986_v51 }
  0xa4   :  { %2574 = vmatpush.msk.msrb.mxu0 %vm164_vm0, %v112_v27 }
  0xa6   :  { %v370_v34 = vpop.permute.xlu1 %369 }
  0xa7   :  { %v374_v37 = vsel %vm371_vm4, %v368_v22, %v370_v34  ;;  %v131_v38 = vpop.permute.xlu0 %130  ;;  %v3115_v22 = vld [vmem:[#allocation5 + $0x14] sm:$0xf] }
  0xa8   :  { %v392_v40 = vmul.f32 %v3657_v29, %v374_v37  ;;  %v137_v41 = vsel %vm136_vm2, %v129_v59, %v131_v38  ;;  %v138_v42 = vsel %vm136_vm2, %v131_v38, %v133_v5  ;;  %v3053_v45 = vpop.permute.xlu2 %799  ;;  %v3655_v59 = vperm.slane %v3037_v28, 0  ;;  %v3134_v38 = vld [vmem:[#allocation5 + $0x18] sm:$0xf] }
  0xa9   :  { %v155_v48 = vmul.f32 %v147_v32, %v137_v41  ;;  %v156_v49 = vmul.f32 %v148_v33, %v138_v42  ;;  %v3642_v42 = vperm.slane %v3115_v22, 3 }
  0xaa   :  { %2588 = vmatpush.msk.msra.mxu3 %vm164_vm0, %v392_v40  ;;  %v3652_v40 = vperm.slane %v3081_v58, 1 }
  0xab   :  { %2568 = vmatpush.msk.msra.mxu1 %vm164_vm0, %v155_v48  ;;  %2570 = vmatpush.msk.msra.mxu2 %vm164_vm0, %v156_v49 }
  0xac   :  { %2569 = vmatmul.msk.f32.vlgmr.msra.gmra.mxu1 %vm161_vm3, %v2986_v51  ;;  %2571 = vmatmul.msk.f32.vlgmr.msra.gmra.mxu2 %vm161_vm3, %v2986_v51  ;;  %v3648_v51 = vperm.slane %v3081_v58, 3 }
  0xad   :  { %2575 = vmatmul.msk.f32.vlgmr.msrb.gmra.mxu0 %vm161_vm3, %v2892_v1  ;;  %2576 = vmatpush.msk.msrb.mxu1 %vm164_vm0, %v113_v52 }
  0xae   :  { %2578 = vmatpush.msk.msrb.mxu2 %vm164_vm0, %v114_v53  ;;  %v394_v55 = vpop.permute.xlu1 %393 }
  0xaf   :  { %v510_v56 = vpop.permute.xlu0 %509  ;;  %2589 = vmatmul.msk.f32.vlgmr.msra.gmra.mxu3 %vm161_vm3, %v394_v55 }
  0xb0   :  { %2586 = vmatpush.msk.msra.mxu2 %vm164_vm0, %v391_v54  ;;  %v496_v57 = vpop.permute.xlu2 %495 }
  0xb4   :  { %2577 = vmatmul.msk.f32.vlgmr.msrb.gmra.mxu1 %vm161_vm3, %v2892_v1  ;;  %2579 = vmatmul.msk.f32.vlgmr.msrb.gmra.mxu2 %vm161_vm3, %v2892_v1 }
  0xb6   :  { %v512_v0 = vpop.permute.xlu1 %511 }
  0xb7   :  { %v516_v3 = vsel %vm513_vm5, %v510_v56, %v512_v0  ;;  %v364_v5 = vpop.permute.xlu0 %363 }
  0xb8   :  { %v534_v7 = vmul.f32 %v3648_v51, %v516_v3  ;;  %v372_v8 = vsel %vm371_vm4, %v364_v5, %v366_v25  ;;  %v379_v10 = vsel %vm371_vm4, %v3022_v17, %v364_v5  ;;  %v3096_v1 = vpop.permute.xlu2 %941  ;;  %v3157_v3 = vld [vmem:[#allocation5 + $0x1c] sm:$0xf] }
  0xb9   :  { %v389_v13 = vmul.f32 %v3655_v59, %v379_v10  ;;  %v390_v14 = vmul.f32 %v3654_v63, %v372_v8 }
  0xba   :  { %2596 = vmatpush.msk.msrb.mxu3 %vm164_vm0, %v534_v7  ;;  %v3638_v7 = vperm.slane %v3134_v38, 3 }
  0xbb   :  { %2582 = vmatpush.msk.msra.mxu0 %vm164_vm0, %v389_v13  ;;  %2584 = vmatpush.msk.msra.mxu1 %vm164_vm0, %v390_v14 }
  0xbc   :  { %2583 = vmatmul.msk.f32.vlgmr.msra.gmra.mxu0 %vm161_vm3, %v394_v55  ;;  %2585 = vmatmul.msk.f32.vlgmr.msra.gmra.mxu1 %vm161_vm3, %v394_v55 }
  0xbd   :  { %2587 = vmatmul.msk.f32.vlgmr.msra.gmra.mxu2 %vm161_vm3, %v394_v55  ;;  %2604 = vmatpush.msk.msra.mxu3 %vm164_vm0, %v2929_v24  ;;  %v3643_v24 = vperm.slane %v3115_v22, 2 }
  0xbe   :  { %v536_v15 = vpop.permute.xlu1 %535 }
  0xbf   :  { %v3111_v17 = vpop.permute.xlu0 %768  ;;  %2597 = vmatmul.msk.f32.vlgmr.msrb.gmra.mxu3 %vm161_vm3, %v536_v15 }
  0xc0   :  { %v508_v20 = vpop.permute.xlu2 %507 }
  0xc1   :  { %v515_v21 = vsel %vm513_vm5, %v508_v20, %v510_v56 }
  0xc2   :  { %v533_v2 = vmul.f32 %v3649_v16, %v515_v21 }
  0xc4   :  { %2594 = vmatpush.msk.msrb.mxu2 %vm164_vm0, %v533_v2  ;;  %v3637_v2 = vperm.slane %v3157_v3, 3 }
  0xc5   :  { %2595 = vmatmul.msk.f32.vlgmr.msrb.gmra.mxu2 %vm161_vm3, %v536_v15 }
  0xc6   :  { %v771_v25 = vpop.permute.xlu1 %770  ;;  %2602 = vmatpush.msk.msra.mxu2 %vm164_vm0, %v2927_v23  ;;  %v3641_v23 = vperm.slane %v3134_v38, 2 }
  0xc7   :  { %v775_v26 = vsel %vm772_vm6, %v3111_v17, %v771_v25  ;;  %v3126_v27 = vpop.permute.xlu0 %910  ;;  %2605 = vmatmul.msk.f32.vlgmr.msra.gmra.mxu3 %vm161_vm3, %v3010_v9 }
  0xc8   :  { %v3130_v34 = vpop.permute.xlu2 %1083  ;;  %v797_v37 = vmul.f32 %v3643_v24, %v775_v26 }
  0xca   :  { %2610 = vmatpush.msk.msrb.mxu2 %vm164_vm0, %v797_v37 }
  0xcd   :  { %2603 = vmatmul.msk.f32.vlgmr.msra.gmra.mxu2 %vm161_vm3, %v3010_v9 }
  0xce   :  { %v913_v41 = vpop.permute.xlu1 %912 }
  0xcf   :  { %v917_v46 = vsel %vm914_vm7, %v3126_v27, %v913_v41  ;;  %v506_v48 = vpop.permute.xlu0 %505 }
  0xd0   :  { %v939_v49 = vmul.f32 %v3641_v23, %v917_v46  ;;  %v514_v50 = vsel %vm513_vm5, %v506_v48, %v508_v20  ;;  %v521_v52 = vsel %vm513_vm5, %v496_v57, %v506_v48  ;;  %v783_v53 = vpop.permute.xlu2 %782  ;;  %v3636_v57 = vperm.slane %v3157_v3, 2 }
  0xd1   :  { %v531_v54 = vmul.f32 %v3653_v39, %v521_v52  ;;  %v532_v55 = vmul.f32 %v3652_v40, %v514_v50  ;;  %v785_v56 = vsel %vm772_vm6, %v771_v25, %v783_v53  ;;  %v3204_v50 = vld [vmem:[#allocation5 + $0x20] sm:$0xf] }
  0xd2   :  { %v798_v0 = vmul.f32 %v3642_v42, %v785_v56  ;;  %2618 = vmatpush.msk.msra.mxu2 %vm164_vm0, %v939_v49  ;;  %v3639_v56 = vperm.slane %v3134_v38, 0 }
  0xd3   :  { %2590 = vmatpush.msk.msrb.mxu0 %vm164_vm0, %v531_v54  ;;  %2592 = vmatpush.msk.msrb.mxu1 %vm164_vm0, %v532_v55 }
  0xd4   :  { %2612 = vmatpush.msk.msrb.mxu3 %vm164_vm0, %v798_v0  ;;  %2591 = vmatmul.msk.f32.vlgmr.msrb.gmra.mxu0 %vm161_vm3, %v536_v15 }
  0xd5   :  { %2593 = vmatmul.msk.f32.vlgmr.msrb.gmra.mxu1 %vm161_vm3, %v536_v15  ;;  %2611 = vmatmul.msk.f32.vlgmr.msrb.gmra.mxu2 %vm161_vm3, %v3053_v45 }
  0xd6   :  { %2613 = vmatmul.msk.f32.vlgmr.msrb.gmra.mxu3 %vm161_vm3, %v3053_v45  ;;  %v1055_v5 = vpop.permute.xlu1 %1054  ;;  %2598 = vmatpush.msk.msra.mxu0 %vm164_vm0, %v2964_v43  ;;  %v3646_v43 = vperm.slane %v3115_v22, 1 }
  0xd7   :  { %v1053_v8 = vpop.permute.xlu0 %1052  ;;  %2600 = vmatpush.msk.msra.mxu1 %vm164_vm0, %v2966_v44  ;;  %v3647_v44 = vperm.slane %v3115_v22, 0 }
  0xd8   :  { %v1059_v10 = vsel %vm1056_vm8, %v1053_v8, %v1055_v5  ;;  %v925_v13 = vpop.permute.xlu2 %924 }
  0xd9   :  { %v1081_v14 = vmul.f32 %v3636_v57, %v1059_v10  ;;  %v927_v15 = vsel %vm914_vm7, %v913_v41, %v925_v13 }
  0xda   :  { %v940_v20 = vmul.f32 %v3638_v7, %v927_v15 }
  0xdb   :  { %2626 = vmatpush.msk.msrb.mxu2 %vm164_vm0, %v1081_v14 }
  0xdc   :  { %2620 = vmatpush.msk.msra.mxu3 %vm164_vm0, %v940_v20  ;;  %2599 = vmatmul.msk.f32.vlgmr.msra.gmra.mxu0 %vm161_vm3, %v3010_v9 }
  0xdd   :  { %2601 = vmatmul.msk.f32.vlgmr.msra.gmra.mxu1 %vm161_vm3, %v3010_v9  ;;  %2619 = vmatmul.msk.f32.vlgmr.msra.gmra.mxu2 %vm161_vm3, %v3096_v1 }
  0xde   :  { %2621 = vmatmul.msk.f32.vlgmr.msra.gmra.mxu3 %vm161_vm3, %v3096_v1  ;;  %v767_v21 = vpop.permute.xlu1 %766 }
  0xdf   :  { %v774_v25 = vsel %vm772_vm6, %v767_v21, %v3111_v17  ;;  %v765_v26 = vpop.permute.xlu0 %764  ;;  %v3631_v17 = vperm.slane %v3204_v50, 2 }
  0xe0   :  { %v796_v37 = vmul.f32 %v3646_v43, %v774_v25  ;;  %v773_v9 = vsel %vm772_vm6, %v765_v26, %v767_v21  ;;  %v1067_v41 = vpop.permute.xlu2 %1066 }
  0xe1   :  { %v795_v46 = vmul.f32 %v3647_v44, %v773_v9  ;;  %v1069_v48 = vsel %vm1056_vm8, %v1055_v5, %v1067_v41  ;;  %v3630_v5 = vperm.slane %v3204_v50, 3 }
  0xe2   :  { %v1082_v49 = vmul.f32 %v3637_v2, %v1069_v48  ;;  %2608 = vmatpush.msk.msrb.mxu1 %vm164_vm0, %v796_v37  ;;  %v3635_v37 = vperm.slane %v3157_v3, 0 }
  0xe3   :  { %2606 = vmatpush.msk.msrb.mxu0 %vm164_vm0, %v795_v46 }
  0xe4   :  { %2628 = vmatpush.msk.msrb.mxu3 %vm164_vm0, %v1082_v49  ;;  %2607 = vmatmul.msk.f32.vlgmr.msrb.gmra.mxu0 %vm161_vm3, %v3053_v45 }
  0xe5   :  { %2609 = vmatmul.msk.f32.vlgmr.msrb.gmra.mxu1 %vm161_vm3, %v3053_v45  ;;  %2627 = vmatmul.msk.f32.vlgmr.msrb.gmra.mxu2 %vm161_vm3, %v3130_v34  ;;  %v3640_v45 = vperm.slane %v3134_v38, 1 }
  0xe6   :  { %2629 = vmatmul.msk.f32.vlgmr.msrb.gmra.mxu3 %vm161_vm3, %v3130_v34  ;;  %v1197_v52 = vpop.permute.xlu1 %1196 }
  0xe7   :  { %v1195_v53 = vpop.permute.xlu0 %1194 }
  0xe8   :  { %v1201_v54 = vsel %vm1198_vm9, %v1195_v53, %v1197_v52 }
  0xe9   :  { %v1223_v55 = vmul.f32 %v3631_v17, %v1201_v54 }
  0xeb   :  { %2634 = vmatpush.msk.msra.mxu2 %vm164_vm0, %v1223_v55 }
  0xee   :  { %v909_v0 = vpop.permute.xlu1 %908 }
  0xef   :  { %v916_v10 = vsel %vm914_vm7, %v909_v0, %v3126_v27  ;;  %v907_v13 = vpop.permute.xlu0 %906  ;;  %v3634_v27 = vperm.slane %v3157_v3, 1 }
  0xf0   :  { %v938_v14 = vmul.f32 %v3640_v45, %v916_v10  ;;  %v915_v15 = vsel %vm914_vm7, %v907_v13, %v909_v0  ;;  %v1209_v20 = vpop.permute.xlu2 %1208 }
  0xf1   :  { %v937_v21 = vmul.f32 %v3639_v56, %v915_v15  ;;  %v1211_v25 = vsel %vm1198_vm9, %v1197_v52, %v1209_v20 }
  0xf2   :  { %v1224_v26 = vmul.f32 %v3630_v5, %v1211_v25  ;;  %2616 = vmatpush.msk.msra.mxu1 %vm164_vm0, %v938_v14 }
  0xf3   :  { %2614 = vmatpush.msk.msra.mxu0 %vm164_vm0, %v937_v21  ;;  %2617 = vmatmul.msk.f32.vlgmr.msra.gmra.mxu1 %vm161_vm3, %v3096_v1 }
  0xf4   :  { %2636 = vmatpush.msk.msra.mxu3 %vm164_vm0, %v1224_v26  ;;  %2615 = vmatmul.msk.f32.vlgmr.msra.gmra.mxu0 %vm161_vm3, %v3096_v1  ;;  %v3632_v1 = vperm.slane %v3204_v50, 1 }
  0xf6   :  { %v1051_v9 = vpop.permute.xlu1 %1050 }
  0xf7   :  { %v1058_v41 = vsel %vm1056_vm8, %v1051_v9, %v1053_v8  ;;  %v1049_v46 = vpop.permute.xlu0 %1048  ;;  %v3633_v8 = vperm.slane %v3204_v50, 0 }
  0xf8   :  { %v1080_v48 = vmul.f32 %v3634_v27, %v1058_v41  ;;  %v1057_v49 = vsel %vm1056_vm8, %v1049_v46, %v1051_v9  ;;  %v1226_v52 = vpop.permute.xlu2 %1225 }
  0xf9   :  { %v1079_v54 = vmul.f32 %v3635_v37, %v1057_v49  ;;  %2635 = vmatmul.msk.f32.vlgmr.msra.gmra.mxu2 %vm161_vm3, %v1226_v52  ;;  %2637 = vmatmul.msk.f32.vlgmr.msra.gmra.mxu3 %vm161_vm3, %v1226_v52 }
  0xfa   :  { %2624 = vmatpush.msk.msrb.mxu1 %vm164_vm0, %v1080_v48 }
  0xfb   :  { %2622 = vmatpush.msk.msrb.mxu0 %vm164_vm0, %v1079_v54  ;;  %2625 = vmatmul.msk.f32.vlgmr.msrb.gmra.mxu1 %vm161_vm3, %v3130_v34 }
  0xfc   :  { %2623 = vmatmul.msk.f32.vlgmr.msrb.gmra.mxu0 %vm161_vm3, %v3130_v34 }
 0x100   :  { %v1193_v55 = vpop.permute.xlu1 %1192  ;;  %v1191_v0 = vpop.permute.xlu0 %1190 }
 0x101   :  { %v1200_v10 = vsel %vm1198_vm9, %v1193_v55, %v1195_v53  ;;  %v1199_v13 = vsel %vm1198_vm9, %v1191_v0, %v1193_v55 }
 0x102   :  { %v1222_v14 = vmul.f32 %v3632_v1, %v1200_v10  ;;  %v1221_v15 = vmul.f32 %v3633_v8, %v1199_v13 }
 0x104   :  { %2630 = vmatpush.msk.msra.mxu0 %vm164_vm0, %v1221_v15  ;;  %2632 = vmatpush.msk.msra.mxu1 %vm164_vm0, %v1222_v14 }
 0x105   :  { %2631 = vmatmul.msk.f32.vlgmr.msra.gmra.mxu0 %vm161_vm3, %v1226_v52  ;;  %2633 = vmatmul.msk.f32.vlgmr.msra.gmra.mxu1 %vm161_vm3, %v1226_v52 }
 0x117   :  { %v254_v20 = vpop.f32.mrf.mxu3 }
 0x11f   :  { %v348_v26 = vpop.f32.mrf.mxu3 }
 0x120   :  { %v194_v25 = vpop.f32.mrf.mxu0  ;;  %v349_v23 = vadd.f32 %v348_v26, %v254_v20 }
 0x129   :  { %v214_v21 = vpop.f32.mrf.mxu1 }
 0x12a   :  { %v288_v46 = vpop.f32.mrf.mxu0 }
 0x12b   :  { %v289_v42 = vadd.f32 %v288_v46, %v194_v25 }
 0x12f   :  { %v234_v34 = vpop.f32.mrf.mxu2 }
 0x131   :  { %v308_v9 = vpop.f32.mrf.mxu1 }
 0x132   :  { %v486_v48 = vpop.f32.mrf.mxu3  ;;  %v309_v24 = vadd.f32 %v308_v9, %v214_v21 }
 0x133   :  { %v492_v43 = vadd.f32 %v486_v48, %v349_v23  ;;  %v3290_v48 = vld [vmem:[%s3626_s5] sm:$0xf] }
 0x134   :  { %1769 = vrot.lane.b32.xlu2 %v3290_v48, %s2826_s23 }
 0x137   :  { %v328_v53 = vpop.f32.mrf.mxu2 }
 0x138   :  { %v329_v56 = vadd.f32 %v328_v53, %v234_v34 }
 0x139   :  { %v446_v49 = vpop.f32.mrf.mxu1  ;;  %v426_v54 = vpop.f32.mrf.mxu0 }
 0x13a   :  { %v489_v44 = vadd.f32 %v426_v54, %v289_v42  ;;  %v490_v51 = vadd.f32 %v446_v49, %v309_v24  ;;  %v2834_v49 = vmov 0  }
 0x13b   :  { %2731 = vset.pattern.permute.xlu2 %v2834_v49  ;;  %2732 = vset.pattern.permute.xlu0 %v2834_v49 }
 0x13c   :  { %1994 = vrot.lane.b32.xlu2 %v3290_v48, %s2828_s25 }
 0x140   :  { %v466_v41 = vpop.f32.mrf.mxu2 }
 0x141   :  { %v491_v45 = vadd.f32 %v466_v41, %v329_v56 }
 0x142   :  { %v628_v0 = vpop.f32.mrf.mxu3 }
 0x143   :  { %v634_v40 = vadd.f32 %v628_v0, %v492_v43 }
 0x148   :  { %v608_v55 = vpop.f32.mrf.mxu2 }
 0x149   :  { %v633_v12 = vadd.f32 %v608_v55, %v491_v45 }
 0x14a   :  { %v750_v15 = vpop.f32.mrf.mxu3 }
 0x14b   :  { %v756_v29 = vadd.f32 %v750_v15, %v634_v40 }
 0x150   :  { %v730_v14 = vpop.f32.mrf.mxu2 }
 0x151   :  { %v568_v13 = vpop.f32.mrf.mxu0  ;;  %v755_v16 = vadd.f32 %v730_v14, %v633_v12 }
 0x152   :  { %v588_v10 = vpop.f32.mrf.mxu1  ;;  %v631_v39 = vadd.f32 %v568_v13, %v489_v44 }
 0x153   :  { %v632_v63 = vadd.f32 %v588_v10, %v490_v51 }
 0x158   :  { %v872_v17 = vpop.f32.mrf.mxu2 }
 0x159   :  { %v690_v52 = vpop.f32.mrf.mxu0  ;;  %v892_v1 = vpop.f32.mrf.mxu3  ;;  %v897_v47 = vadd.f32 %v872_v17, %v755_v16 }
 0x15a   :  { %v710_v5 = vpop.f32.mrf.mxu1  ;;  %v753_v4 = vadd.f32 %v690_v52, %v631_v39  ;;  %v898_v20 = vadd.f32 %v892_v1, %v756_v29 }
 0x15b   :  { %v754_v34 = vadd.f32 %v710_v5, %v632_v63 }
 0x160   :  { %v1014_v37 = vpop.f32.mrf.mxu2 }
 0x161   :  { %v832_v27 = vpop.f32.mrf.mxu0  ;;  %v1034_v57 = vpop.f32.mrf.mxu3  ;;  %v1039_v56 = vadd.f32 %v1014_v37, %v897_v47 }
 0x162   :  { %v852_v8 = vpop.f32.mrf.mxu1  ;;  %v895_v53 = vadd.f32 %v832_v27, %v753_v4  ;;  %v1040_v23 = vadd.f32 %v1034_v57, %v898_v20 }
 0x163   :  { %v896_v21 = vadd.f32 %v852_v8, %v754_v34 }
 0x168   :  { %v1156_v11 = vpop.f32.mrf.mxu2 }
 0x169   :  { %v1176_v30 = vpop.f32.mrf.mxu3  ;;  %v1181_v45 = vadd.f32 %v1156_v11, %v1039_v56 }
 0x16a   :  { %v1182_v43 = vadd.f32 %v1176_v30, %v1040_v23 }
 0x170   :  { %v994_v2 = vpop.f32.mrf.mxu1 }
 0x171   :  { %v974_v7 = vpop.f32.mrf.mxu0  ;;  %v1038_v24 = vadd.f32 %v994_v2, %v896_v21  ;;  %v1325_v21 = vld [vmem:[%s3624_s3] sm:$0xf] }
 0x172   :  { %v1037_v42 = vadd.f32 %v974_v7, %v895_v53 }
 0x178   :  { %v1136_v31 = vpop.f32.mrf.mxu1 }
 0x179   :  { %v1116_v59 = vpop.f32.mrf.mxu0  ;;  %v1180_v51 = vadd.f32 %v1136_v31, %v1038_v24  ;;  %v1326_v24 = vld [vmem:[%s3625_s4] sm:$0xf] }
 0x17a   :  { %v1179_v44 = vadd.f32 %v1116_v59, %v1037_v42 }
 0x17c   :  { %v1298_v25 = vpop.f32.mrf.mxu2  ;;  %v1318_v26 = vpop.f32.mrf.mxu3 }
 0x17d   :  { %v3269_v12 = vadd.f32 %v1298_v25, %v1181_v45  ;;  %v3271_v40 = vadd.f32 %v1318_v26, %v1182_v43 }
 0x17f   :  { %v1339_v4 = vmul.f32 %v3269_v12, %v3269_v12  ;;  %v1330_v30 = vsel %vm164_vm0, %v3269_v12, 0.0  ;;  %v1340_v31 = vmul.f32 %v3271_v40, %v3271_v40  ;;  %v1332_v27 = vsel %vm164_vm0, %v3271_v40, 0.0 }
 0x181   :  { %v1344_v37 = vsel %vm164_vm0, %v1339_v4, 0.0  ;;  %v1346_v41 = vsel %vm164_vm0, %v1340_v31, 0.0 }
 0x182   :  { %v1258_v9 = vpop.f32.mrf.mxu0  ;;  %v1278_v16 = vpop.f32.mrf.mxu1 }
 0x183   :  { %v1321_v63 = vadd.f32 %v1258_v9, %v1179_v44  ;;  %v1322_v47 = vadd.f32 %v1278_v16, %v1180_v51 }
 0x185   :  { %v1327_v11 = vsel %vm164_vm0, %v1321_v63, 0.0  ;;  %v1337_v29 = vmul.f32 %v1321_v63, %v1321_v63  ;;  %v1328_v39 = vsel %vm164_vm0, %v1322_v47, 0.0  ;;  %v1338_v57 = vmul.f32 %v1322_v47, %v1322_v47 }
 0x186   :  { %v1329_v7 = vadd.f32 %v1328_v39, %v1327_v11 }
 0x187   :  { %v1341_v59 = vsel %vm164_vm0, %v1337_v29, 0.0  ;;  %v1342_v2 = vsel %vm164_vm0, %v1338_v57, 0.0 }
 0x188   :  { %v1331_v17 = vadd.f32 %v1330_v30, %v1329_v7  ;;  %v1343_v5 = vadd.f32 %v1342_v2, %v1341_v59 }
 0x18a   :  { %v1333_v1 = vadd.f32 %v1332_v27, %v1331_v17  ;;  %v1345_v8 = vadd.f32 %v1344_v37, %v1343_v5 }
 0x18c   :  { %1334 = vadd.xlane.f32.xlu0 %v1333_v1  ;;  %v1347_v46 = vadd.f32 %v1346_v41, %v1345_v8 }
 0x18e   :  { %1348 = vadd.xlane.f32.xlu1 %v1347_v46  ;;  %v3310_v43 = vpop.permute.xlu2 %1769 }
 0x196   :  { %v3312_v44 = vpop.permute.xlu2 %1994 }
 0x1a0   :  { %1437 = vrot.lane.b32.xlu0 %v3290_v48, %s2819_s1 }
 0x1a7   :  { %1648 = vrot.lane.b32.xlu1 %v3290_v48, %s2824_s21 }
 0x1a8   :  { %2115 = vrot.lane.b32.xlu0 %v3290_v48, %s2830_s27 }
 0x1af   :  { %1873 = vrot.lane.b32.xlu1 %v3290_v48, %s2823_s20 }
 0x1ff   :  { %v1335_v54 = vpop.xlane.xlu0 %1334 }
 0x200   :  { %v1336_v55 = vmul.f32 0.001953125, %v1335_v54 }
 0x201   :  { %v1349_v0 = vpop.xlane.xlu1 %1348 }
 0x202   :  { %v1351_v10 = vmul.f32 %v1336_v55, %v1336_v55  ;;  %v1350_v13 = vmul.f32 0.001953125, %v1349_v0 }
 0x204   :  { %v1352_v14 = vsub.f32 %v1350_v13, %v1351_v10 }
 0x206   :  { %v1353_v15 = vadd.f32 1e-05, %v1352_v14 }
 0x208   :  { %2733 = vrsqrt.f32 %v1353_v15  ;;  %vm1360_vm11 = vweird.f32 %v1353_v15 }
 0x20e   :  { %v2734_v52 = vpop.eup %2733 }
 0x20f   :  { %v1355_v34 = vmul.f32 %v2734_v52, %v1353_v15  ;;  %vm1361_vm10 = vweird.f32 %v2734_v52 }
 0x210   :  { %vm1362_vm12 = vmor %vm1360_vm11, %vm1361_vm10 }
 0x211   :  { %v1356_v56 = vmul.f32 %v2734_v52, %v1355_v34 }
 0x212   :  { %v1438_v2 = vpop.permute.xlu0 %1437 }
 0x213   :  { %v1357_v20 = vmul.f32 0.5, %v1356_v56 }
 0x215   :  { %v1358_v53 = vsub.f32 1.5, %v1357_v20 }
 0x217   :  { %v1359_v25 = vmul.f32 %v2734_v52, %v1358_v53 }
 0x219   :  { %v1363_v45 = vsel %vm1362_vm12, %v2734_v52, %v1359_v25  ;;  %v3659_v25 = vperm.slane %v3001_v61, 3 }
 0x21a   :  { %v1364_v23 = vmul.f32 %v1363_v45, %v1325_v21  ;;  %v3399_v1 = vpop.permute.xlu0 %2115 }
 0x21c   :  { %1369 = vperm.xlu2 %2731, %v1364_v23   ;;  %v1365_v42 = vmul.f32 %v1364_v23, %v1336_v55  ;;  %v3660_v23 = vperm.slane %v3037_v28, 3 }
 0x21e   :  { %v1366_v26 = vsub.f32 %v1326_v24, %v1365_v42 }
 0x224   :  { %1378 = vperm.xlu2 %2731, %v1366_v26  }
 0x276   :  { %v1370_v51 = vpop.permute.xlu2 %1369 }
 0x277   :  { %v1372_v9 = vmul.f32 %v1370_v51, %v1321_v63  ;;  %v1373_v16 = vmul.f32 %v1370_v51, %v1322_v47  ;;  %v1374_v7 = vmul.f32 %v1370_v51, %v3269_v12  ;;  %v1375_v30 = vmul.f32 %v1370_v51, %v3271_v40  ;;  %v3386_v40 = vpop.permute.xlu1 %1648 }
 0x278   :  { %v3661_v51 = vperm.slane %v3037_v28, 2 }
 0x27e   :  { %v1379_v4 = vpop.permute.xlu2 %1378 }
 0x27f   :  { %v1381_v11 = vadd.f32 %v1379_v4, %v1372_v9  ;;  %v1382_v29 = vadd.f32 %v1379_v4, %v1373_v16  ;;  %v1383_v63 = vadd.f32 %v1379_v4, %v1374_v7  ;;  %v1384_v47 = vadd.f32 %v1379_v4, %v1375_v30  ;;  %v3397_v37 = vpop.permute.xlu1 %1873 }
 0x281   :  { %v3314_v39 = vmax.f32 %v1381_v11, 0.0  ;;  %v3316_v57 = vmax.f32 %v1382_v29, 0.0  ;;  %v3326_v31 = vmax.f32 %v1383_v63, 0.0  ;;  %v3328_v59 = vmax.f32 %v1384_v47, 0.0 }
 0x282   :  { %v3662_v63 = vperm.slane %v3037_v28, 0 }
 0x283   :  { %1399 = vrot.lane.b32.xlu1 %v3316_v57, %s2820_s18  ;;  %1420 = vrot.lane.b32.xlu2 %v3316_v57, %s2821_s2 }
 0x284   :  { %1397 = vrot.lane.b32.xlu0 %v3314_v39, %s2820_s18 }
 0x28b   :  { %1634 = vrot.lane.b32.xlu1 %v3326_v31, %s2822_s19  ;;  %1422 = vrot.lane.b32.xlu2 %v3326_v31, %s2821_s2 }
 0x28c   :  { %1627 = vrot.lane.b32.xlu0 %v3328_v59, %s2822_s19 }
 0x293   :  { %1748 = vrot.lane.b32.xlu1 %v3328_v59, %s2825_s22  ;;  %1415 = vrot.lane.b32.xlu2 %v3328_v59, %s2821_s2 }
 0x294   :  { %1753 = vrot.lane.b32.xlu0 %v3316_v57, %s2825_s22 }
 0x29b   :  { %1973 = vrot.lane.b32.xlu1 %v3314_v39, %s2827_s24  ;;  %1418 = vrot.lane.b32.xlu2 %v3314_v39, %s2821_s2 }
 0x29c   :  { %1751 = vrot.lane.b32.xlu0 %v3314_v39, %s2825_s22 }
 0x2a3   :  { %2098 = vrot.lane.b32.xlu1 %v3326_v31, %s2829_s26  ;;  %1401 = vrot.lane.b32.xlu2 %v3326_v31, %s2820_s18 }
 0x2a4   :  { %1977 = vrot.lane.b32.xlu0 %v3326_v31, %s2827_s24 }
 0x2ab   :  { %2096 = vrot.lane.b32.xlu1 %v3316_v57, %s2829_s26  ;;  %1391 = vrot.lane.b32.xlu2 %v3328_v59, %s2820_s18 }
 0x2ac   :  { %1975 = vrot.lane.b32.xlu0 %v3316_v57, %s2827_s24 }
 0x2b3   :  { %2221 = vrot.lane.b32.xlu1 %v3328_v59, %s2823_s20  ;;  %1632 = vrot.lane.b32.xlu2 %v3316_v57, %s2822_s19 }
 0x2b4   :  { %2100 = vrot.lane.b32.xlu0 %v3328_v59, %s2829_s26 }
 0x2bb   :  { %2236 = vrot.lane.b32.xlu1 %v3290_v48, %s2831_s28  ;;  %1630 = vrot.lane.b32.xlu2 %v3314_v39, %s2822_s19 }
 0x2bc   :  { %2215 = vrot.lane.b32.xlu0 %v3314_v39, %s2823_s20 }
 0x2c3   :  { %2336 = vrot.lane.b32.xlu1 %v3314_v39, %s2832_s29  ;;  %1755 = vrot.lane.b32.xlu2 %v3326_v31, %s2825_s22 }
 0x2c4   :  { %2340 = vrot.lane.b32.xlu0 %v3326_v31, %s2832_s29 }
 0x2cb   :  { %1979 = vrot.lane.b32.xlu2 %v3328_v59, %s2827_s24 }
 0x2cc   :  { %2338 = vrot.lane.b32.xlu0 %v3316_v57, %s2832_s29 }
 0x2d3   :  { %2094 = vrot.lane.b32.xlu2 %v3314_v39, %s2829_s26 }
 0x2db   :  { %2219 = vrot.lane.b32.xlu2 %v3326_v31, %s2823_s20 }
 0x2dd   :  { %v1421_v12 = vpop.permute.xlu2 %1420 }
 0x2e3   :  { %2217 = vrot.lane.b32.xlu2 %v3316_v57, %s2823_s20 }
 0x2e5   :  { %v1423_v17 = vpop.permute.xlu2 %1422 }
 0x2e6   :  { %v1425_v5 = vsel %vm136_vm2, %v1421_v12, %v1423_v17 }
 0x2e7   :  { %v1434_v27 = vmul.f32 %v1425_v5, %v148_v33 }
 0x2e9   :  { %2642 = vmatpush.msk.msrb.mxu2 %vm164_vm0, %v1434_v27  ;;  %v3665_v27 = vperm.slane %v3081_v58, 1 }
 0x2ea   :  { %2643 = vmatmul.msk.f32.vlgmr.msrb.gmra.mxu2 %vm161_vm3, %v1438_v2 }
 0x2eb   :  { %2342 = vrot.lane.b32.xlu2 %v3328_v59, %s2832_s29 }
 0x2ed   :  { %v1416_v8 = vpop.permute.xlu2 %1415 }
 0x2ee   :  { %v1426_v41 = vsel %vm136_vm2, %v1423_v17, %v1416_v8  ;;  %v3664_v17 = vperm.slane %v3081_v58, 0 }
 0x2ef   :  { %v1435_v46 = vmul.f32 %v1426_v41, %v149_v62  ;;  %v3666_v41 = vperm.slane %v2905_v6, 0 }
 0x2f1   :  { %2644 = vmatpush.msk.msrb.mxu3 %vm164_vm0, %v1435_v46  ;;  %v3667_v46 = vperm.slane %v2905_v6, 1 }
 0x2f2   :  { %2645 = vmatmul.msk.f32.vlgmr.msrb.gmra.mxu3 %vm161_vm3, %v1438_v2 }
 0x2f3   :  { %2357 = vrot.lane.b32.xlu2 %v3290_v48, %s2833_s30 }
 0x2f5   :  { %v1400_v33 = vpop.permute.xlu1 %1399  ;;  %v1419_v49 = vpop.permute.xlu2 %1418 }
 0x2f6   :  { %v1424_v54 = vsel %vm136_vm2, %v1419_v49, %v1421_v12  ;;  %v1431_v55 = vsel %vm136_vm2, %v1416_v8, %v1419_v49  ;;  %v1398_v0 = vpop.permute.xlu0 %1397  ;;  %v3663_v12 = vperm.slane %v3037_v28, 1  ;;  %v1869_v28 = vmul.f32 %v3314_v39, %v3666_v41 }
 0x2f7   :  { %v1432_v10 = vmul.f32 %v1431_v55, %v146_v18  ;;  %v1433_v62 = vmul.f32 %v1424_v54, %v147_v32  ;;  %v1403_v13 = vsel %vm94_vm1, %v1398_v0, %v1400_v33  ;;  %v3668_v39 = vperm.slane %v3081_v58, 2 }
 0x2f8   :  { %v1412_v14 = vmul.f32 %v1403_v13, %v105_v36 }
 0x2f9   :  { %2638 = vmatpush.msk.msrb.mxu0 %vm164_vm0, %v1432_v10  ;;  %2640 = vmatpush.msk.msrb.mxu1 %vm164_vm0, %v1433_v62  ;;  %v3669_v10 = vperm.slane %v3081_v58, 3  ;;  %v3672_v58 = vperm.slane %v2905_v6, 2 }
 0x2fa   :  { %2639 = vmatmul.msk.f32.vlgmr.msrb.gmra.mxu0 %vm161_vm3, %v1438_v2  ;;  %2641 = vmatmul.msk.f32.vlgmr.msrb.gmra.mxu1 %vm161_vm3, %v1438_v2 }
 0x2fb   :  { %2648 = vmatpush.msk.msra.mxu1 %vm164_vm0, %v1412_v14 }
 0x2fd   :  { %v1635_v15 = vpop.permute.xlu1 %1634  ;;  %v1402_v18 = vpop.permute.xlu2 %1401 }
 0x2fe   :  { %v1404_v60 = vsel %vm94_vm1, %v1400_v33, %v1402_v18  ;;  %v1628_v32 = vpop.permute.xlu0 %1627  ;;  %v1870_v33 = vmul.f32 %v3316_v57, %v3667_v46 }
 0x2ff   :  { %v1413_v52 = vmul.f32 %v1404_v60, %v106_v35  ;;  %v1638_v56 = vsel %vm371_vm4, %v1635_v15, %v1628_v32  ;;  %v3671_v60 = vperm.slane %v3115_v22, 1 }
 0x300   :  { %v1647_v42 = vmul.f32 %v1638_v56, %v3660_v23 }
 0x301   :  { %2650 = vmatpush.msk.msra.mxu2 %vm164_vm0, %v1413_v52  ;;  %v1871_v52 = vmul.f32 %v3326_v31, %v3672_v58 }
 0x302   :  { %2649 = vmatmul.msk.f32.vlgmr.msra.gmra.mxu1 %vm161_vm3, %v3290_v48  ;;  %2651 = vmatmul.msk.f32.vlgmr.msra.gmra.mxu2 %vm161_vm3, %v3290_v48 }
 0x305   :  { %v1749_v36 = vpop.permute.xlu1 %1748  ;;  %v1392_v34 = vpop.permute.xlu2 %1391 }
 0x306   :  { %v1405_v20 = vsel %vm94_vm1, %v1402_v18, %v1392_v34  ;;  %v1410_v53 = vsel %vm94_vm1, %v1392_v34, %v1398_v0  ;;  %v1754_v21 = vpop.permute.xlu0 %1753 }
 0x307   :  { %v1411_v35 = vmul.f32 %v1410_v53, %v104_v19  ;;  %v1414_v45 = vmul.f32 %v1405_v20, %v3659_v25  ;;  %v3674_v53 = vperm.slane %v3115_v22, 2 }
 0x309   :  { %2646 = vmatpush.msk.msra.mxu0 %vm164_vm0, %v1411_v35  ;;  %2652 = vmatpush.msk.msra.mxu3 %vm164_vm0, %v1414_v45  ;;  %v3676_v45 = vperm.slane %v3134_v38, 2 }
 0x30a   :  { %2647 = vmatmul.msk.f32.vlgmr.msra.gmra.mxu0 %vm161_vm3, %v3290_v48  ;;  %2653 = vmatmul.msk.f32.vlgmr.msra.gmra.mxu3 %vm161_vm3, %v3290_v48 }
 0x30b   :  { %2660 = vmatpush.msk.msrb.mxu3 %vm164_vm0, %v1647_v42  ;;  %v3677_v42 = vperm.slane %v3134_v38, 1 }
 0x30d   :  { %v1974_v24 = vpop.permute.xlu1 %1973  ;;  %v1633_v19 = vpop.permute.xlu2 %1632 }
 0x30e   :  { %v1637_v61 = vsel %vm371_vm4, %v1633_v19, %v1635_v15  ;;  %v1752_v26 = vpop.permute.xlu0 %1751  ;;  %v3670_v15 = vperm.slane %v3115_v22, 0 }
 0x30f   :  { %v1646_v9 = vmul.f32 %v1637_v61, %v3661_v51  ;;  %v1757_v48 = vsel %vm513_vm5, %v1752_v26, %v1754_v21  ;;  %v1764_v4 = vsel %vm513_vm5, %v1749_v36, %v1752_v26 }
 0x310   :  { %v1765_v5 = vmul.f32 %v1764_v4, %v3664_v17  ;;  %v1766_v8 = vmul.f32 %v1757_v48, %v3665_v27  ;;  %v3679_v48 = vperm.slane %v3134_v38, 3 }
 0x311   :  { %2658 = vmatpush.msk.msrb.mxu2 %vm164_vm0, %v1646_v9  ;;  %v3678_v9 = vperm.slane %v3134_v38, 0 }
 0x312   :  { %2659 = vmatmul.msk.f32.vlgmr.msrb.gmra.mxu2 %vm161_vm3, %v3386_v40  ;;  %2661 = vmatmul.msk.f32.vlgmr.msrb.gmra.mxu3 %vm161_vm3, %v3386_v40 }
 0x315   :  { %v1631_v16 = vpop.permute.xlu2 %1630  ;;  %v2099_v11 = vpop.permute.xlu1 %2098 }
 0x316   :  { %v1636_v29 = vsel %vm371_vm4, %v1631_v16, %v1633_v19  ;;  %v1643_v7 = vsel %vm371_vm4, %v1628_v32, %v1631_v16  ;;  %v1978_v30 = vpop.permute.xlu0 %1977 }
 0x317   :  { %v1644_v47 = vmul.f32 %v1643_v7, %v3662_v63  ;;  %v1645_v2 = vmul.f32 %v1636_v29, %v3663_v12 }
 0x319   :  { %2654 = vmatpush.msk.msrb.mxu0 %vm164_vm0, %v1644_v47  ;;  %2656 = vmatpush.msk.msrb.mxu1 %vm164_vm0, %v1645_v2  ;;  %v3681_v47 = vperm.slane %v3157_v3, 2 }
 0x31a   :  { %2655 = vmatmul.msk.f32.vlgmr.msrb.gmra.mxu0 %vm161_vm3, %v3386_v40  ;;  %2657 = vmatmul.msk.f32.vlgmr.msrb.gmra.mxu1 %vm161_vm3, %v3386_v40 }
 0x31b   :  { %2662 = vmatpush.msk.msra.mxu0 %vm164_vm0, %v1765_v5  ;;  %2664 = vmatpush.msk.msra.mxu1 %vm164_vm0, %v1766_v8  ;;  %v3682_v8 = vperm.slane %v3157_v3, 0 }
 0x31d   :  { %2670 = vmatpush.msk.msrb.mxu0 %vm164_vm0, %v1869_v28  ;;  %2672 = vmatpush.msk.msrb.mxu1 %vm164_vm0, %v1870_v33  ;;  %v1756_v49 = vpop.permute.xlu2 %1755  ;;  %v2097_v13 = vpop.permute.xlu1 %2096  ;;  %v3683_v28 = vperm.slane %v3157_v3, 1 }
 0x31e   :  { %v1758_v54 = vsel %vm513_vm5, %v1754_v21, %v1756_v49  ;;  %v1759_v40 = vsel %vm513_vm5, %v1756_v49, %v1749_v36  ;;  %v1976_v55 = vpop.permute.xlu0 %1975  ;;  %v3673_v36 = vperm.slane %v2905_v6, 3  ;;  %v2103_v20 = vsel %vm914_vm7, %v2097_v13, %v2099_v11 }
 0x31f   :  { %v1767_v0 = vmul.f32 %v1758_v54, %v3668_v39  ;;  %v1768_v57 = vmul.f32 %v1759_v40, %v3669_v10  ;;  %v1981_v62 = vsel %vm772_vm6, %v1974_v24, %v1976_v55  ;;  %v1982_v14 = vsel %vm772_vm6, %v1976_v55, %v1978_v30 }
 0x320   :  { %v1990_v18 = vmul.f32 %v1981_v62, %v3670_v15  ;;  %v1991_v32 = vmul.f32 %v1982_v14, %v3671_v60  ;;  %v1872_v34 = vmul.f32 %v3328_v59, %v3673_v36  ;;  %v3684_v54 = vperm.slane %v3204_v50, 0 }
 0x321   :  { %2666 = vmatpush.msk.msra.mxu2 %vm164_vm0, %v1767_v0  ;;  %2668 = vmatpush.msk.msra.mxu3 %vm164_vm0, %v1768_v57  ;;  %v3685_v40 = vperm.slane %v3204_v50, 1  ;;  %v3686_v10 = vperm.slane %v3204_v50, 2  ;;  %v3687_v62 = vperm.slane %v3204_v50, 3 }
 0x322   :  { %2663 = vmatmul.msk.f32.vlgmr.msra.gmra.mxu0 %vm161_vm3, %v3310_v43  ;;  %2665 = vmatmul.msk.f32.vlgmr.msra.gmra.mxu1 %vm161_vm3, %v3310_v43 }
 0x323   :  { %2667 = vmatmul.msk.f32.vlgmr.msra.gmra.mxu2 %vm161_vm3, %v3310_v43  ;;  %2669 = vmatmul.msk.f32.vlgmr.msra.gmra.mxu3 %vm161_vm3, %v3310_v43  ;;  %v3675_v43 = vperm.slane %v3115_v22, 3 }
 0x324   :  { %2674 = vmatpush.msk.msrb.mxu2 %vm164_vm0, %v1871_v52  ;;  %2676 = vmatpush.msk.msrb.mxu3 %vm164_vm0, %v1872_v34 }
 0x325   :  { %2678 = vmatpush.msk.msra.mxu0 %vm164_vm0, %v1990_v18  ;;  %2680 = vmatpush.msk.msra.mxu1 %vm164_vm0, %v1991_v32  ;;  %v1980_v56 = vpop.permute.xlu2 %1979  ;;  %v2222_v19 = vpop.permute.xlu1 %2221 }
 0x326   :  { %v1983_v31 = vsel %vm772_vm6, %v1978_v30, %v1980_v56  ;;  %v1989_v6 = vsel %vm772_vm6, %v1980_v56, %v1974_v24  ;;  %v2101_v59 = vpop.permute.xlu0 %2100  ;;  %v2112_v24 = vmul.f32 %v2103_v20, %v3677_v42 }
 0x327   :  { %v1992_v21 = vmul.f32 %v1983_v31, %v3674_v53  ;;  %v1993_v35 = vmul.f32 %v1989_v6, %v3675_v43  ;;  %v2104_v25 = vsel %vm914_vm7, %v2099_v11, %v2101_v59 }
 0x328   :  { %v2113_v23 = vmul.f32 %v2104_v25, %v3676_v45 }
 0x329   :  { %2682 = vmatpush.msk.msra.mxu2 %vm164_vm0, %v1992_v21  ;;  %2684 = vmatpush.msk.msra.mxu3 %vm164_vm0, %v1993_v35 }
 0x32a   :  { %2671 = vmatmul.msk.f32.vlgmr.msrb.gmra.mxu0 %vm161_vm3, %v3397_v37  ;;  %2673 = vmatmul.msk.f32.vlgmr.msrb.gmra.mxu1 %vm161_vm3, %v3397_v37 }
 0x32b   :  { %2675 = vmatmul.msk.f32.vlgmr.msrb.gmra.mxu2 %vm161_vm3, %v3397_v37  ;;  %2677 = vmatmul.msk.f32.vlgmr.msrb.gmra.mxu3 %vm161_vm3, %v3397_v37  ;;  %v3680_v37 = vperm.slane %v3157_v3, 3 }
 0x32c   :  { %2688 = vmatpush.msk.msrb.mxu1 %vm164_vm0, %v2112_v24  ;;  %2690 = vmatpush.msk.msrb.mxu2 %vm164_vm0, %v2113_v23 }
 0x32d   :  { %v2095_v22 = vpop.permute.xlu2 %2094  ;;  %v2237_v38 = vpop.permute.xlu1 %2236 }
 0x32e   :  { %v2102_v61 = vsel %vm914_vm7, %v2095_v22, %v2097_v13  ;;  %v2110_v26 = vsel %vm914_vm7, %v2101_v59, %v2095_v22  ;;  %v2216_v51 = vpop.permute.xlu0 %2215 }
 0x32f   :  { %v2111_v16 = vmul.f32 %v2102_v61, %v3678_v9  ;;  %v2114_v4 = vmul.f32 %v2110_v26, %v3679_v48  ;;  %v2231_v11 = vsel %vm1056_vm8, %v2222_v19, %v2216_v51 }
 0x330   :  { %v2235_v29 = vmul.f32 %v2231_v11, %v3680_v37 }
 0x331   :  { %2686 = vmatpush.msk.msrb.mxu0 %vm164_vm0, %v2111_v16  ;;  %2692 = vmatpush.msk.msrb.mxu3 %vm164_vm0, %v2114_v4 }
 0x332   :  { %2679 = vmatmul.msk.f32.vlgmr.msra.gmra.mxu0 %vm161_vm3, %v3312_v44  ;;  %2681 = vmatmul.msk.f32.vlgmr.msra.gmra.mxu1 %vm161_vm3, %v3312_v44 }
 0x333   :  { %2683 = vmatmul.msk.f32.vlgmr.msra.gmra.mxu2 %vm161_vm3, %v3312_v44  ;;  %2685 = vmatmul.msk.f32.vlgmr.msra.gmra.mxu3 %vm161_vm3, %v3312_v44 }
 0x334   :  { %2700 = vmatpush.msk.msra.mxu3 %vm164_vm0, %v2235_v29 }
 0x335   :  { %v2220_v7 = vpop.permute.xlu2 %2219  ;;  %v2337_v2 = vpop.permute.xlu1 %2336 }
 0x336   :  { %v2225_v30 = vsel %vm1056_vm8, %v2220_v7, %v2222_v19  ;;  %v2341_v63 = vpop.permute.xlu0 %2340 }
 0x337   :  { %v2234_v12 = vmul.f32 %v2225_v30, %v3681_v47 }
 0x339   :  { %2698 = vmatpush.msk.msra.mxu2 %vm164_vm0, %v2234_v12 }
 0x33a   :  { %2687 = vmatmul.msk.f32.vlgmr.msrb.gmra.mxu0 %vm161_vm3, %v3399_v1  ;;  %2689 = vmatmul.msk.f32.vlgmr.msrb.gmra.mxu1 %vm161_vm3, %v3399_v1 }
 0x33b   :  { %2691 = vmatmul.msk.f32.vlgmr.msrb.gmra.mxu2 %vm161_vm3, %v3399_v1  ;;  %2693 = vmatmul.msk.f32.vlgmr.msrb.gmra.mxu3 %vm161_vm3, %v3399_v1 }
 0x33d   :  { %v2218_v44 = vpop.permute.xlu2 %2217 }
 0x33e   :  { %v2223_v17 = vsel %vm1056_vm8, %v2216_v51, %v2218_v44  ;;  %v2224_v5 = vsel %vm1056_vm8, %v2218_v44, %v2220_v7  ;;  %v2339_v27 = vpop.permute.xlu0 %2338 }
 0x33f   :  { %v2232_v41 = vmul.f32 %v2223_v17, %v3682_v8  ;;  %v2233_v46 = vmul.f32 %v2224_v5, %v3683_v28  ;;  %v2344_v33 = vsel %vm1198_vm9, %v2337_v2, %v2339_v27  ;;  %v2345_v49 = vsel %vm1198_vm9, %v2339_v27, %v2341_v63 }
 0x340   :  { %v2353_v1 = vmul.f32 %v2344_v33, %v3684_v54  ;;  %v2354_v55 = vmul.f32 %v2345_v49, %v3685_v40 }
 0x341   :  { %2694 = vmatpush.msk.msra.mxu0 %vm164_vm0, %v2232_v41  ;;  %2696 = vmatpush.msk.msra.mxu1 %vm164_vm0, %v2233_v46 }
 0x342   :  { %2695 = vmatmul.msk.f32.vlgmr.msra.gmra.mxu0 %vm161_vm3, %v2237_v38  ;;  %2697 = vmatmul.msk.f32.vlgmr.msra.gmra.mxu1 %vm161_vm3, %v2237_v38 }
 0x343   :  { %2699 = vmatmul.msk.f32.vlgmr.msra.gmra.mxu2 %vm161_vm3, %v2237_v38  ;;  %2701 = vmatmul.msk.f32.vlgmr.msra.gmra.mxu3 %vm161_vm3, %v2237_v38 }
 0x344   :  { %2702 = vmatpush.msk.msrb.mxu0 %vm164_vm0, %v2353_v1  ;;  %2704 = vmatpush.msk.msrb.mxu1 %vm164_vm0, %v2354_v55 }
 0x345   :  { %v2343_v3 = vpop.permute.xlu2 %2342 }
 0x346   :  { %v2346_v39 = vsel %vm1198_vm9, %v2341_v63, %v2343_v3  ;;  %v2352_v0 = vsel %vm1198_vm9, %v2343_v3, %v2337_v2 }
 0x347   :  { %v2355_v57 = vmul.f32 %v2346_v39, %v3686_v10  ;;  %v2356_v13 = vmul.f32 %v2352_v0, %v3687_v62 }
 0x349   :  { %2706 = vmatpush.msk.msrb.mxu2 %vm164_vm0, %v2355_v57  ;;  %2708 = vmatpush.msk.msrb.mxu3 %vm164_vm0, %v2356_v13 }
 0x34d   :  { %v2358_v14 = vpop.permute.xlu2 %2357 }
 0x34e   :  { %2703 = vmatmul.msk.f32.vlgmr.msrb.gmra.mxu0 %vm161_vm3, %v2358_v14  ;;  %2705 = vmatmul.msk.f32.vlgmr.msrb.gmra.mxu1 %vm161_vm3, %v2358_v14 }
 0x34f   :  { %2707 = vmatmul.msk.f32.vlgmr.msrb.gmra.mxu2 %vm161_vm3, %v2358_v14  ;;  %2709 = vmatmul.msk.f32.vlgmr.msrb.gmra.mxu3 %vm161_vm3, %v2358_v14 }
 0x36d   :  { %v1510_v32 = vpop.f32.mrf.mxu2 }
 0x375   :  { %v1530_v60 = vpop.f32.mrf.mxu3 }
 0x377   :  { %v1490_v15 = vpop.f32.mrf.mxu1  ;;  %v1470_v18 = vpop.f32.mrf.mxu0 }
 0x37f   :  { %v1584_v58 = vpop.f32.mrf.mxu1 }
 0x380   :  { %v1585_v26 = vadd.f32 %v1584_v58, %v1490_v15 }
 0x385   :  { %v1604_v36 = vpop.f32.mrf.mxu2 }
 0x386   :  { %v1605_v63 = vadd.f32 %v1604_v36, %v1510_v32 }
 0x387   :  { %v1564_v50 = vpop.f32.mrf.mxu0 }
 0x388   :  { %v1565_v51 = vadd.f32 %v1564_v50, %v1470_v18 }
 0x38d   :  { %v1624_v52 = vpop.f32.mrf.mxu3 }
 0x38e   :  { %v1625_v47 = vadd.f32 %v1624_v52, %v1530_v60 }
 0x395   :  { %v1721_v31 = vpop.f32.mrf.mxu2  ;;  %v1741_v6 = vpop.f32.mrf.mxu3 }
 0x396   :  { %v1746_v2 = vadd.f32 %v1721_v31, %v1605_v63  ;;  %v1747_v17 = vadd.f32 %v1741_v6, %v1625_v47  ;;  %v2458_v47 = vld [vmem:[%s3628_s7] sm:$0xf] }
 0x397   :  { %v1681_v34 = vpop.f32.mrf.mxu0  ;;  %v1701_v56 = vpop.f32.mrf.mxu1 }
 0x398   :  { %v1744_v9 = vadd.f32 %v1681_v34, %v1565_v51  ;;  %v1745_v16 = vadd.f32 %v1701_v56, %v1585_v26 }
 0x39f   :  { %v1802_v59 = vpop.f32.mrf.mxu0  ;;  %v1822_v20 = vpop.f32.mrf.mxu1 }
 0x3a0   :  { %v1865_v11 = vadd.f32 %v1802_v59, %v1744_v9  ;;  %v1866_v37 = vadd.f32 %v1822_v20, %v1745_v16 }
 0x3a6   :  { %v1842_v53 = vpop.f32.mrf.mxu2  ;;  %v1862_v21 = vpop.f32.mrf.mxu3 }
 0x3a7   :  { %v1906_v43 = vpop.f32.mrf.mxu0  ;;  %v1926_v35 = vpop.f32.mrf.mxu1  ;;  %v1867_v8 = vadd.f32 %v1842_v53, %v1746_v2  ;;  %v1868_v41 = vadd.f32 %v1862_v21, %v1747_v17 }
 0x3a8   :  { %v1969_v7 = vadd.f32 %v1906_v43, %v1865_v11  ;;  %v1970_v30 = vadd.f32 %v1926_v35, %v1866_v37 }
 0x3ae   :  { %v1946_v25 = vpop.f32.mrf.mxu2  ;;  %v1966_v45 = vpop.f32.mrf.mxu3 }
 0x3af   :  { %v2027_v23 = vpop.f32.mrf.mxu0  ;;  %v2047_v42 = vpop.f32.mrf.mxu1  ;;  %v1971_v54 = vadd.f32 %v1946_v25, %v1867_v8  ;;  %v1972_v1 = vadd.f32 %v1966_v45, %v1868_v41  ;;  %v2520_v8 = vld.sshfl [vmem:[#allocation1] sm:$0xff pattern:$0x75316420]  ;;  %v2521_v41 = vld.sshfl [vmem:[#allocation1 + $0x8] sm:$0xff pattern:$0x75316420] }
 0x3b0   :  { %v2090_v12 = vadd.f32 %v2027_v23, %v1969_v7  ;;  %v2091_v44 = vadd.f32 %v2047_v42, %v1970_v30 }
 0x3b6   :  { %v2067_v24 = vpop.f32.mrf.mxu2  ;;  %v2087_v19 = vpop.f32.mrf.mxu3 }
 0x3b7   :  { %v2148_v22 = vpop.f32.mrf.mxu0  ;;  %v2168_v61 = vpop.f32.mrf.mxu1  ;;  %v2092_v0 = vadd.f32 %v2067_v24, %v1971_v54  ;;  %v2093_v10 = vadd.f32 %v2087_v19, %v1972_v1 }
 0x3b8   :  { %v2211_v5 = vadd.f32 %v2148_v22, %v2090_v12  ;;  %v2212_v27 = vadd.f32 %v2168_v61, %v2091_v44 }
 0x3be   :  { %v2188_v48 = vpop.f32.mrf.mxu2  ;;  %v2208_v4 = vpop.f32.mrf.mxu3 }
 0x3bf   :  { %v2269_v29 = vpop.f32.mrf.mxu0  ;;  %v2289_v38 = vpop.f32.mrf.mxu1  ;;  %v2213_v57 = vadd.f32 %v2188_v48, %v2092_v0  ;;  %v2214_v62 = vadd.f32 %v2208_v4, %v2093_v10 }
 0x3c0   :  { %v2332_v28 = vadd.f32 %v2269_v29, %v2211_v5  ;;  %v2333_v46 = vadd.f32 %v2289_v38, %v2212_v27  ;;  %v2457_v29 = vld [vmem:[%s3627_s6] sm:$0xf]  ;;  %s2835_s6 = smov [#allocation7]  }
 0x3c1   :  { %s2553_s7 = sshll.u32 %s2835_s6, 4  ;;  %s2554_s7 = int_to_ptr.vmem [resolvable:$true] %s2553_s7 }
 0x3c6   :  { %v2309_v33 = vpop.f32.mrf.mxu2  ;;  %v2329_v49 = vpop.f32.mrf.mxu3 }
 0x3c7   :  { %v2334_v15 = vadd.f32 %v2309_v33, %v2213_v57  ;;  %v2335_v18 = vadd.f32 %v2329_v49, %v2214_v62 }
 0x3cb   :  { %v2390_v40 = vpop.f32.mrf.mxu0  ;;  %v2410_v55 = vpop.f32.mrf.mxu1 }
 0x3cc   :  { %v2453_v3 = vadd.f32 %v2390_v40, %v2332_v28  ;;  %v2454_v39 = vadd.f32 %v2410_v55, %v2333_v46  ;;  %v2522_v28 = vld.sshfl [vmem:[#allocation1 + $0x10] sm:$0xff pattern:$0x75316420]  ;;  %v2523_v46 = vld.sshfl [vmem:[#allocation1 + $0x18] sm:$0xff pattern:$0x75316420] }
 0x3ce   :  { %v2469_v13 = vmul.f32 %v2453_v3, %v2453_v3  ;;  %v2470_v14 = vmul.f32 %v2454_v39, %v2454_v39  ;;  %v2459_v60 = vsel %vm164_vm0, %v2453_v3, 0.0  ;;  %v2460_v32 = vsel %vm164_vm0, %v2454_v39, 0.0 }
 0x3cf   :  { %v2461_v31 = vadd.f32 %v2460_v32, %v2459_v60 }
 0x3d0   :  { %v2473_v34 = vsel %vm164_vm0, %v2469_v13, 0.0  ;;  %v2474_v56 = vsel %vm164_vm0, %v2470_v14, 0.0 }
 0x3d1   :  { %v2475_v21 = vadd.f32 %v2474_v56, %v2473_v34 }
 0x3d2   :  { %v2430_v58 = vpop.f32.mrf.mxu2  ;;  %v2450_v50 = vpop.f32.mrf.mxu3 }
 0x3d3   :  { %v2455_v52 = vadd.f32 %v2430_v58, %v2334_v15  ;;  %v2456_v36 = vadd.f32 %v2450_v50, %v2335_v18 }
 0x3d5   :  { %v2471_v6 = vmul.f32 %v2455_v52, %v2455_v52  ;;  %v2462_v59 = vsel %vm164_vm0, %v2455_v52, 0.0  ;;  %v2472_v20 = vmul.f32 %v2456_v36, %v2456_v36  ;;  %v2464_v43 = vsel %vm164_vm0, %v2456_v36, 0.0 }
 0x3d6   :  { %v2463_v53 = vadd.f32 %v2462_v59, %v2461_v31 }
 0x3d7   :  { %v2476_v35 = vsel %vm164_vm0, %v2471_v6, 0.0  ;;  %v2478_v23 = vsel %vm164_vm0, %v2472_v20, 0.0 }
 0x3d8   :  { %v2465_v25 = vadd.f32 %v2464_v43, %v2463_v53  ;;  %v2477_v45 = vadd.f32 %v2476_v35, %v2475_v21 }
 0x3da   :  { %2466 = vadd.xlane.f32.xlu1 %v2465_v25  ;;  %v2479_v42 = vadd.f32 %v2478_v23, %v2477_v45 }
 0x3dc   :  { %2480 = vadd.xlane.f32.xlu0 %v2479_v42 }
 0x44d   :  { %v2467_v24 = vpop.xlane.xlu1 %2466 }
 0x44e   :  { %v2468_v19 = vmul.f32 0.001953125, %v2467_v24 }
 0x44f   :  { %v2481_v22 = vpop.xlane.xlu0 %2480 }
 0x450   :  { %v2483_v61 = vmul.f32 %v2468_v19, %v2468_v19  ;;  %v2482_v26 = vmul.f32 0.001953125, %v2481_v22 }
 0x452   :  { %v2484_v51 = vsub.f32 %v2482_v26, %v2483_v61 }
 0x454   :  { %v2485_v9 = vadd.f32 1e-05, %v2484_v51 }
 0x456   :  { %2735 = vrsqrt.f32 %v2485_v9  ;;  %vm2492_vm14 = vweird.f32 %v2485_v9 }
 0x45c   :  { %v2736_v16 = vpop.eup %2735 }
 0x45d   :  { %v2487_v48 = vmul.f32 %v2736_v16, %v2485_v9  ;;  %vm2493_vm13 = vweird.f32 %v2736_v16 }
 0x45e   :  { %vm2494_vm15 = vmor %vm2492_vm14, %vm2493_vm13 }
 0x45f   :  { %v2488_v4 = vmul.f32 %v2736_v16, %v2487_v48 }
 0x461   :  { %v2489_v11 = vmul.f32 0.5, %v2488_v4 }
 0x463   :  { %v2490_v37 = vsub.f32 1.5, %v2489_v11 }
 0x465   :  { %v2491_v38 = vmul.f32 %v2736_v16, %v2490_v37 }
 0x467   :  { %v2495_v7 = vsel %vm2494_vm15, %v2736_v16, %v2491_v38 }
 0x468   :  { %v2496_v30 = vmul.f32 %v2495_v7, %v2457_v29 }
 0x46a   :  { %2501 = vperm.xlu2 %2731, %v2496_v30   ;;  %v2497_v63 = vmul.f32 %v2496_v30, %v2468_v19 }
 0x46c   :  { %v2498_v12 = vsub.f32 %v2458_v47, %v2497_v63 }
 0x472   :  { %2510 = vperm.xlu2 %2731, %v2498_v12  }
 0x4c4   :  { %v2502_v44 = vpop.permute.xlu2 %2501 }
 0x4c5   :  { %v2504_v2 = vmul.f32 %v2502_v44, %v2453_v3  ;;  %v2505_v17 = vmul.f32 %v2502_v44, %v2454_v39  ;;  %v2506_v5 = vmul.f32 %v2502_v44, %v2455_v52  ;;  %v2507_v27 = vmul.f32 %v2502_v44, %v2456_v36 }
 0x4cc   :  { %v2511_v33 = vpop.permute.xlu2 %2510 }
 0x4cd   :  { %v2513_v49 = vadd.f32 %v2511_v33, %v2504_v2  ;;  %v2514_v54 = vadd.f32 %v2511_v33, %v2505_v17  ;;  %v2515_v1 = vadd.f32 %v2511_v33, %v2506_v5  ;;  %v2516_v40 = vadd.f32 %v2511_v33, %v2507_v27 }
 0x4cf   :  { %v2528_v55 = vadd.f32 %v2520_v8, %v2513_v49  ;;  %v2529_v0 = vadd.f32 %v2521_v41, %v2514_v54  ;;  %v2530_v10 = vadd.f32 %v2522_v28, %v2515_v1  ;;  %v2531_v57 = vadd.f32 %v2523_v46, %v2516_v40 }
 0x4d1   :  { %v2533_v62 = vmax.f32 %v2529_v0, 0.0  ;;  %v2535_v13 = vmax.f32 %v2531_v57, 0.0  ;;  %v2532_v3 = vmax.f32 %v2528_v55, 0.0  ;;  %v2534_v39 = vmax.f32 %v2530_v10, 0.0 }
 0x4d3   :  { %v2540_v14 = vrot.slane %v2533_v62, 4  ;;  %v2541_v15 = vrot.slane %v2535_v13, 4 }
 0x4d5   :  { %v2542_v18 = vsel %vm164_vm0, %v2532_v3, %v2540_v14  ;;  %v2543_v60 = vsel %vm164_vm0, %v2534_v39, %v2541_v15 }
 0x4d6   :  { %2546 = vst [vmem:[#allocation7] sm:$0xff] %v2542_v18 }
 0x4d7   :  { %2547 = vst [vmem:[#allocation7 + $0x8] sm:$0xff] %v2543_v60 }
 0x4d8   :  { %2558 = dma.vmem_to_hbm [thread:$0]  %s2554_s7, 256, %s2556_s17, [#allocation4]  }
 0x4d9   :  { %2813 = dma.done.wait [#allocation4], 256  }
 0x4da   :  { %2814 = vsyncadd [#allocation4], 4294967040 }
 0x4db   :  { %2563 = vsyncpa [#allocation3], 1 }
 0x4dc   :  { %2564 = vsyncpa [#allocation6], 1 }
 0x4dd   :  { %2565 = vsyncpa [#allocation4], 1 }

</bundles_post_ra>
